<compile_context>
chip_gen: v7x
topology: tpu7x:2x2x1
jax: 0.10.0
libtpu: 0.0.40
codegen_flags: <defaults>
</compile_context>

<pallas_src>
import functools
from typing import NamedTuple

import jax
import jax.numpy as jnp
from jax.experimental import pallas as pl
from jax.experimental.pallas import tpu as pltpu


def _round_up(x, m):
    return (x + m - 1) // m * m


class _Geom(NamedTuple):
    N: int; C_in: int; F_out: int; H: int; W: int
    Cp: int; Fp: int
    wp2: int; hw2: int; halo: int
    pws: int          # per-image lane stride (multiple of 128)
    G: int            # grid blocks
    NB: int           # images folded into one block's lane axis
    Lout: int         # output lane width per block = NB * pws
    XW: int           # input lane width per block
    ML: int           # 128-aligned interior offset in the hidden scratch
    SW: int           # hidden scratch lane width


def _geometry(N, C_in, F_out, H, W):
    Cp = _round_up(C_in, 16)          # bf16 sublane tile = 16 -> aligned concat
    Fp = _round_up(F_out, 16)
    wp2 = W + 2
    hw2 = H * wp2                     # flattened per-image output width (with 2 wrap cols/row)
    halo = W + 3                      # max reach of a centred 3x3 tap on the flat axis
    pws = _round_up(hw2 + 2 * halo, 128)
    G = min(N, 2)                     # keep >= 2 "parallel" blocks for v7x's 2 TCs
    NB = -(-N // G)
    Lout = NB * pws
    XW = _round_up(Lout + 2 * halo, 128)
    ML = _round_up(halo, 128)
    SW = ML + Lout + _round_up(halo, 128)
    return _Geom(N=N, C_in=C_in, F_out=F_out, H=H, W=W, Cp=Cp, Fp=Fp, wp2=wp2,
                 hw2=hw2, halo=halo, pws=pws, G=G, NB=NB, Lout=Lout, XW=XW,
                 ML=ML, SW=SW)


def _dip_kernel(x_ref, w1_ref, b1_ref, w2_ref, b2_ref, mask_ref, o_ref, h_scr,
                *, wp2, halo, ML, Lout):
    # x_ref   : (1, Cp, XW)    bf16  padded/flattened inputs, image j at lane j*pws
    # w1_ref  : (Fp, 9*Cp)     bf16  conv1 weights, K index = (kh*3+kw)*Cp + c
    # b1_ref  : (Fp, 1)        f32
    # w2_ref  : (Fp, 9*Fp)     bf16  conv2 weights, K index = (kh*3+kw)*Fp + f
    # b2_ref  : (Fp, 1)        f32
    # mask_ref: (1, Lout)      f32   1.0 on real output lanes, 0.0 elsewhere
    # o_ref   : (1, Fp, Lout)  f32   lane-dense output slab (Lout % 128 == 0)
    # h_scr   : (Fp, SW)       bf16  scratch for the zero-padded hidden activation
    Fp = h_scr.shape[0]

    def conv3x3(read, w_ref):
        # Fold all 9 taps into one deep contraction: single MXU dot per conv.
        stack = jnp.concatenate(
            [read(kh * wp2 + kw) for kh in range(3) for kw in range(3)],
            axis=0)                                           # (9*C, Lout) bf16
        return jnp.dot(w_ref[...], stack,
                       preferred_element_type=jnp.float32)    # (Fp, Lout) f32

    # ---- conv1 + bias + ReLU (channels on sublanes, flattened space on lanes)
    h = conv3x3(lambda s: x_ref[0, :, s:s + Lout], w1_ref)
    h = jnp.maximum(h + b1_ref[...], 0.0)     # keep elementwise in f32 (v5e: no bf16 VPU)
    h = h * mask_ref[...]                     # zero wrap cols / image tails / gaps

    # ---- stage hidden into scratch (bf16, 128-aligned -> unmasked stores) ----
    h_scr[:, :ML] = jnp.zeros((Fp, ML), h_scr.dtype)                  # leading halo
    h_scr[:, ML + Lout:] = jnp.zeros((Fp, h_scr.shape[1] - ML - Lout), h_scr.dtype)
    h_scr[:, ML:ML + Lout] = h.astype(h_scr.dtype)

    # ---- conv2 + bias ----
    y = conv3x3(lambda s: h_scr[:, ML - halo + s:ML - halo + s + Lout], w2_ref)
    o_ref[0] = y + b2_ref[...]


def prepare_input(x_nchw):
    """Pad/flatten the NCHW input into the kernel's lane-dense slab layout.

    In a DIP loop the noise input is fixed across thousands of forward passes:
    call this once and pass the result to dip_forward(..., prepared=...).
    """
    N, C_in, H, W = x_nchw.shape
    g = _geometry(N, C_in, C_in, H, W)   # feature count does not affect input layout
    x = x_nchw.astype(jnp.bfloat16)
    x_p = jnp.pad(x, ((0, 0), (0, g.Cp - C_in), (1, 1), (1, 1)))       # 1-px border
    x_im = x_p.reshape(N, g.Cp, (H + 2) * (W + 2))
    x_im = jnp.pad(x_im, ((0, g.G * g.NB - N), (0, 0),
                          (0, g.pws - (H + 2) * (W + 2))))
    x_flat = x_im.reshape(g.G, g.NB, g.Cp, g.pws).transpose(0, 2, 1, 3)
    x_flat = x_flat.reshape(g.G, g.Cp, g.NB * g.pws)
    x_flat = jnp.pad(x_flat, ((0, 0), (0, 0), (0, g.XW - g.NB * g.pws)))

    lane = jnp.arange(g.Lout, dtype=jnp.int32)
    r = lane % g.pws
    valid = (r < g.hw2) & ((r % g.wp2) < W)
    mask = valid.astype(jnp.float32).reshape(1, g.Lout)
    return x_flat, mask


def dip_forward(x_nchw, w1, b1, w2, b2, prepared=None):
    """x_nchw: (N, C_in, H, W); w1: (F, C_in, 3, 3); w2: (F, F, 3, 3)."""
    N, C_in, H, W = x_nchw.shape
    F_out = w1.shape[0]
    g = _geometry(N, C_in, F_out, H, W)

    if prepared is None:
        prepared = prepare_input(x_nchw)
    x_flat, mask = prepared

    # Weights OIHW -> (Fp, 9*C), contraction index = (kh*3 + kw)*C + c,
    # matching the kh-major / kw / channel order of the in-kernel concat.
    def prep_w(w, co, ci, cop, cip):
        w_p = jnp.pad(w.astype(jnp.float32),
                      ((0, cop - co), (0, cip - ci), (0, 0), (0, 0)))
        return jnp.transpose(w_p, (0, 2, 3, 1)).reshape(cop, 9 * cip).astype(jnp.bfloat16)

    w1_r = prep_w(w1, F_out, C_in, g.Fp, g.Cp)
    w2_r = prep_w(w2, F_out, F_out, g.Fp, g.Fp)
    b1_r = jnp.pad(b1.astype(jnp.float32), (0, g.Fp - F_out)).reshape(g.Fp, 1)
    b2_r = jnp.pad(b2.astype(jnp.float32), (0, g.Fp - F_out)).reshape(g.Fp, 1)

    kernel = functools.partial(_dip_kernel, wp2=g.wp2, halo=g.halo, ML=g.ML,
                               Lout=g.Lout)

    flops = 2 * g.G * g.Lout * g.Fp * 9 * (g.Cp + g.Fp)
    bytes_accessed = int(2 * (x_flat.size + w1_r.size + w2_r.size)
                         + 4 * (g.G * g.Fp * g.Lout + mask.size
                                + b1_r.size + b2_r.size))
    vmem_need = (2 * g.Cp * g.XW * 2          # double-buffered input block (bf16)
                 + 2 * g.Fp * g.Lout * 4      # double-buffered output block (f32)
                 + (w1_r.size + w2_r.size) * 2
                 + g.Fp * g.SW * 2            # hidden scratch (bf16)
                 + g.Lout * 4 + 2 * g.Fp * 4)
    vmem_limit = int(min(max(4 * vmem_need, 16 * 1024 * 1024), 48 * 1024 * 1024))

    out = pl.pallas_call(
        kernel,
        out_shape=jax.ShapeDtypeStruct((g.G, g.Fp, g.Lout), jnp.float32),
        grid_spec=pltpu.PrefetchScalarGridSpec(
            num_scalar_prefetch=0,
            grid=(g.G,),
            in_specs=[
                pl.BlockSpec((1, g.Cp, g.XW), lambda n: (n, 0, 0)),
                pl.BlockSpec((g.Fp, 9 * g.Cp), lambda n: (0, 0)),
                pl.BlockSpec((g.Fp, 1), lambda n: (0, 0)),
                pl.BlockSpec((g.Fp, 9 * g.Fp), lambda n: (0, 0)),
                pl.BlockSpec((g.Fp, 1), lambda n: (0, 0)),
                pl.BlockSpec((1, g.Lout), lambda n: (0, 0)),
            ],
            out_specs=pl.BlockSpec((1, g.Fp, g.Lout), lambda n: (n, 0, 0)),
            scratch_shapes=[pltpu.VMEM((g.Fp, g.SW), jnp.bfloat16)],
        ),
        compiler_params=pltpu.CompilerParams(
            dimension_semantics=("parallel",),
            vmem_limit_bytes=vmem_limit),
        cost_estimate=pl.CostEstimate(flops=flops, transcendentals=0,
                                      bytes_accessed=bytes_accessed),
    )(x_flat, w1_r, b1_r, w2_r, b2_r, mask)

    # (G, Fp, NB*pws) -> (N, F_out, H, W): drop channel padding, per-image
    # stride padding, the 2 wrap columns per row, and any batch padding.
    # TODO(synk): in a DIP training loop, fuse this crop into the consumer/loss
    # instead of materializing it.
    y = out.reshape(g.G, g.Fp, g.NB, g.pws).transpose(0, 2, 1, 3)
    y = y.reshape(g.G * g.NB, g.Fp, g.pws)[:N, :F_out, :g.hw2]
    y = y.reshape(N, F_out, H, g.wp2)[:, :, :, :W]
    return y


def _reference_forward(x_nchw, w1, b1, w2, b2):
    """Pure-JAX f32 reference (lax conv) of the PyTorch forward pass."""
    dn = ('NCHW', 'OIHW', 'NCHW')
    h = jax.lax.conv_general_dilated(x_nchw, w1, (1, 1), 'SAME',
                                     dimension_numbers=dn)
    h = jnp.maximum(h + b1[None, :, None, None], 0.0)
    y = jax.lax.conv_general_dilated(h, w2, (1, 1), 'SAME',
                                     dimension_numbers=dn)
    return y + b2[None, :, None, None]


def _init_params(key, c_in, n_feat):
    """Deterministic kaiming-uniform-like init matching the module's shapes."""
    k1, k2, k3, k4 = jax.random.split(key, 4)
    fan_in1 = c_in * 9
    fan_in2 = n_feat * 9
    bound1 = (6.0 / fan_in1) ** 0.5           # kaiming_uniform_ (a=0, fan_in)
    bound2 = (6.0 / fan_in2) ** 0.5
    w1 = jax.random.uniform(k1, (n_feat, c_in, 3, 3), jnp.float32,
                            -bound1, bound1)
    w2 = jax.random.uniform(k2, (n_feat, n_feat, 3, 3), jnp.float32,
                            -bound2, bound2)
    bb1 = 1.0 / (fan_in1 ** 0.5)              # PyTorch default bias init
    bb2 = 1.0 / (fan_in2 ** 0.5)
    b1 = jax.random.uniform(k3, (n_feat,), jnp.float32, -bb1, bb1)
    b2 = jax.random.uniform(k4, (n_feat,), jnp.float32, -bb2, bb2)
    return w1, b1, w2, b2


if __name__ == "__main__":
    # small shapes consistent with the module: batch=2, image channels=4,
    # spatial 16x16, intermediate features=32
    N, C_IN, H, W = 2, 4, 16, 16
    N_FEAT = 32

    key = jax.random.PRNGKey(0)
    kx, kp = jax.random.split(key)
    x = jax.random.normal(kx, (N, C_IN, H, W), jnp.float32)
    w1, b1, w2, b2 = _init_params(kp, C_IN, N_FEAT)

    fwd = jax.jit(dip_forward)
    y = jax.block_until_ready(fwd(x, w1, b1, w2, b2))
    y_ref = jax.block_until_ready(_reference_forward(x, w1, b1, w2, b2))

    assert y.shape == (N, N_FEAT, H, W)
    # bf16 MXU operands -> loosened tolerance vs. the f32 reference.
    assert jnp.allclose(y, y_ref, atol=1e-1, rtol=5e-2)

    print("KERNEL_OK")
</pallas_src>

<mosaic_0001>
module attributes {stable_mosaic.version = 11 : i64} {
  func.func @_dip_kernel(%arg0: i32, %arg1: memref<1x16x512xbf16, #tpu.memory_space<vmem>>, %arg2: memref<32x144xbf16, #tpu.memory_space<vmem>>, %arg3: memref<32x1xf32, #tpu.memory_space<vmem>>, %arg4: memref<32x288xbf16, #tpu.memory_space<vmem>>, %arg5: memref<32x1xf32, #tpu.memory_space<vmem>>, %arg6: memref<1x384xf32, #tpu.memory_space<vmem>>, %arg7: memref<1x32x384xf32, #tpu.memory_space<vmem>>, %arg8: memref<32x640xbf16, #tpu.memory_space<vmem>>) attributes {dimension_semantics = [#tpu.dimension_semantics<parallel>], iteration_bounds = array<i64: 2>, scalar_prefetch = 0 : i64, scratch_operands = 1 : i64, tpu.core_type = #tpu.core_type<tc>, window_params = [{transform_indices = @transform_0, window_bounds = array<i64: 1, 16, 512>}, {pipeline_mode = #tpu.pipeline_mode<synchronous>, transform_indices = @transform_1, window_bounds = array<i64: 32, 144>}, {pipeline_mode = #tpu.pipeline_mode<synchronous>, transform_indices = @transform_2, window_bounds = array<i64: 32, 1>}, {pipeline_mode = #tpu.pipeline_mode<synchronous>, transform_indices = @transform_3, window_bounds = array<i64: 32, 288>}, {pipeline_mode = #tpu.pipeline_mode<synchronous>, transform_indices = @transform_4, window_bounds = array<i64: 32, 1>}, {pipeline_mode = #tpu.pipeline_mode<synchronous>, transform_indices = @transform_5, window_bounds = array<i64: 1, 384>}, {transform_indices = @transform_6, window_bounds = array<i64: 1, 32, 384>}]} {
    %c0 = arith.constant 0 : index
    %c0_0 = arith.constant 0 : index
    %c0_1 = arith.constant 0 : index
    %0 = vector.load %arg1[%c0, %c0_0, %c0_1] : memref<1x16x512xbf16, #tpu.memory_space<vmem>>, vector<1x16x384xbf16>
    %1 = vector.shape_cast %0 : vector<1x16x384xbf16> to vector<16x384xbf16>
    %c0_2 = arith.constant 0 : index
    %c0_3 = arith.constant 0 : index
    %c1 = arith.constant 1 : index
    %2 = vector.load %arg1[%c0_2, %c0_3, %c1] : memref<1x16x512xbf16, #tpu.memory_space<vmem>>, vector<1x16x384xbf16>
    %3 = vector.shape_cast %2 : vector<1x16x384xbf16> to vector<16x384xbf16>
    %c0_4 = arith.constant 0 : index
    %c0_5 = arith.constant 0 : index
    %c2 = arith.constant 2 : index
    %4 = vector.load %arg1[%c0_4, %c0_5, %c2] : memref<1x16x512xbf16, #tpu.memory_space<vmem>>, vector<1x16x384xbf16>
    %5 = vector.shape_cast %4 : vector<1x16x384xbf16> to vector<16x384xbf16>
    %c0_6 = arith.constant 0 : index
    %c0_7 = arith.constant 0 : index
    %c18 = arith.constant 18 : index
    %6 = vector.load %arg1[%c0_6, %c0_7, %c18] : memref<1x16x512xbf16, #tpu.memory_space<vmem>>, vector<1x16x384xbf16>
    %7 = vector.shape_cast %6 : vector<1x16x384xbf16> to vector<16x384xbf16>
    %c0_8 = arith.constant 0 : index
    %c0_9 = arith.constant 0 : index
    %c19 = arith.constant 19 : index
    %8 = vector.load %arg1[%c0_8, %c0_9, %c19] : memref<1x16x512xbf16, #tpu.memory_space<vmem>>, vector<1x16x384xbf16>
    %9 = vector.shape_cast %8 : vector<1x16x384xbf16> to vector<16x384xbf16>
    %c0_10 = arith.constant 0 : index
    %c0_11 = arith.constant 0 : index
    %c20 = arith.constant 20 : index
    %10 = vector.load %arg1[%c0_10, %c0_11, %c20] : memref<1x16x512xbf16, #tpu.memory_space<vmem>>, vector<1x16x384xbf16>
    %11 = vector.shape_cast %10 : vector<1x16x384xbf16> to vector<16x384xbf16>
    %c0_12 = arith.constant 0 : index
    %c0_13 = arith.constant 0 : index
    %c36 = arith.constant 36 : index
    %12 = vector.load %arg1[%c0_12, %c0_13, %c36] : memref<1x16x512xbf16, #tpu.memory_space<vmem>>, vector<1x16x384xbf16>
    %13 = vector.shape_cast %12 : vector<1x16x384xbf16> to vector<16x384xbf16>
    %c0_14 = arith.constant 0 : index
    %c0_15 = arith.constant 0 : index
    %c37 = arith.constant 37 : index
    %14 = vector.load %arg1[%c0_14, %c0_15, %c37] : memref<1x16x512xbf16, #tpu.memory_space<vmem>>, vector<1x16x384xbf16>
    %15 = vector.shape_cast %14 : vector<1x16x384xbf16> to vector<16x384xbf16>
    %c0_16 = arith.constant 0 : index
    %c0_17 = arith.constant 0 : index
    %c38 = arith.constant 38 : index
    %16 = vector.load %arg1[%c0_16, %c0_17, %c38] : memref<1x16x512xbf16, #tpu.memory_space<vmem>>, vector<1x16x384xbf16>
    %17 = vector.shape_cast %16 : vector<1x16x384xbf16> to vector<16x384xbf16>
    %18 = tpu.concatenate %1, %3, %5, %7, %9, %11, %13, %15, %17 in 0 : vector<16x384xbf16>, vector<16x384xbf16>, vector<16x384xbf16>, vector<16x384xbf16>, vector<16x384xbf16>, vector<16x384xbf16>, vector<16x384xbf16>, vector<16x384xbf16>, vector<16x384xbf16> -> vector<144x384xbf16>
    %c0_18 = arith.constant 0 : index
    %c0_19 = arith.constant 0 : index
    %19 = vector.load %arg2[%c0_18, %c0_19] : memref<32x144xbf16, #tpu.memory_space<vmem>>, vector<32x144xbf16>
    %cst = arith.constant dense<0.000000e+00> : vector<32x384xf32>
    %20 = tpu.matmul %19, %18, %cst {dimension_numbers = #tpu.dot_dimension_numbers<[1], [0], [0], [1], [0, 0, 1, 1], [], []>} : vector<32x144xbf16>, vector<144x384xbf16>, vector<32x384xf32> -> vector<32x384xf32>
    %c0_20 = arith.constant 0 : index
    %c0_21 = arith.constant 0 : index
    %21 = vector.load %arg3[%c0_20, %c0_21] : memref<32x1xf32, #tpu.memory_space<vmem>>, vector<32x1xf32>
    %22 = vector.broadcast %21 : vector<32x1xf32> to vector<32x384xf32>
    %23 = arith.addf %20, %22 : vector<32x384xf32>
    %cst_22 = arith.constant 0.000000e+00 : f32
    %24 = vector.broadcast %cst_22 : f32 to vector<32x384xf32>
    %25 = arith.maximumf %23, %24 : vector<32x384xf32>
    %c0_23 = arith.constant 0 : index
    %c0_24 = arith.constant 0 : index
    %26 = vector.load %arg6[%c0_23, %c0_24] : memref<1x384xf32, #tpu.memory_space<vmem>>, vector<1x384xf32>
    %27 = vector.broadcast %26 : vector<1x384xf32> to vector<32x384xf32>
    %28 = arith.mulf %25, %27 : vector<32x384xf32>
    %cst_25 = arith.constant 0.000000e+00 : bf16
    %29 = vector.broadcast %cst_25 : bf16 to vector<32x128xbf16>
    %c0_26 = arith.constant 0 : index
    %c0_27 = arith.constant 0 : index
    %30 = vector.load %arg8[%c0_26, %c0_27] : memref<32x640xbf16, #tpu.memory_space<vmem>>, vector<32x128xbf16>
    tpu.vector_store %arg8[%c0_26, %c0_27], %29 {strides = array<i32>} : memref<32x640xbf16, #tpu.memory_space<vmem>>, vector<32x128xbf16>,
    %cst_28 = arith.constant 0.000000e+00 : bf16
    %31 = vector.broadcast %cst_28 : bf16 to vector<32x128xbf16>
    %c0_29 = arith.constant 0 : index
    %c512 = arith.constant 512 : index
    %32 = vector.load %arg8[%c0_29, %c512] : memref<32x640xbf16, #tpu.memory_space<vmem>>, vector<32x128xbf16>
    tpu.vector_store %arg8[%c0_29, %c512], %31 {strides = array<i32>} : memref<32x640xbf16, #tpu.memory_space<vmem>>, vector<32x128xbf16>,
    %33 = arith.truncf %28 : vector<32x384xf32> to vector<32x384xbf16>
    %c0_30 = arith.constant 0 : index
    %c128 = arith.constant 128 : index
    %34 = vector.load %arg8[%c0_30, %c128] : memref<32x640xbf16, #tpu.memory_space<vmem>>, vector<32x384xbf16>
    tpu.vector_store %arg8[%c0_30, %c128], %33 {strides = array<i32>} : memref<32x640xbf16, #tpu.memory_space<vmem>>, vector<32x384xbf16>,
    %c0_31 = arith.constant 0 : index
    %c109 = arith.constant 109 : index
    %35 = vector.load %arg8[%c0_31, %c109] : memref<32x640xbf16, #tpu.memory_space<vmem>>, vector<32x384xbf16>
    %c0_32 = arith.constant 0 : index
    %c110 = arith.constant 110 : index
    %36 = vector.load %arg8[%c0_32, %c110] : memref<32x640xbf16, #tpu.memory_space<vmem>>, vector<32x384xbf16>
    %c0_33 = arith.constant 0 : index
    %c111 = arith.constant 111 : index
    %37 = vector.load %arg8[%c0_33, %c111] : memref<32x640xbf16, #tpu.memory_space<vmem>>, vector<32x384xbf16>
    %c0_34 = arith.constant 0 : index
    %c127 = arith.constant 127 : index
    %38 = vector.load %arg8[%c0_34, %c127] : memref<32x640xbf16, #tpu.memory_space<vmem>>, vector<32x384xbf16>
    %c0_35 = arith.constant 0 : index
    %c128_36 = arith.constant 128 : index
    %39 = vector.load %arg8[%c0_35, %c128_36] : memref<32x640xbf16, #tpu.memory_space<vmem>>, vector<32x384xbf16>
    %c0_37 = arith.constant 0 : index
    %c129 = arith.constant 129 : index
    %40 = vector.load %arg8[%c0_37, %c129] : memref<32x640xbf16, #tpu.memory_space<vmem>>, vector<32x384xbf16>
    %c0_38 = arith.constant 0 : index
    %c145 = arith.constant 145 : index
    %41 = vector.load %arg8[%c0_38, %c145] : memref<32x640xbf16, #tpu.memory_space<vmem>>, vector<32x384xbf16>
    %c0_39 = arith.constant 0 : index
    %c146 = arith.constant 146 : index
    %42 = vector.load %arg8[%c0_39, %c146] : memref<32x640xbf16, #tpu.memory_space<vmem>>, vector<32x384xbf16>
    %c0_40 = arith.constant 0 : index
    %c147 = arith.constant 147 : index
    %43 = vector.load %arg8[%c0_40, %c147] : memref<32x640xbf16, #tpu.memory_space<vmem>>, vector<32x384xbf16>
    %44 = tpu.concatenate %35, %36, %37, %38, %39, %40, %41, %42, %43 in 0 : vector<32x384xbf16>, vector<32x384xbf16>, vector<32x384xbf16>, vector<32x384xbf16>, vector<32x384xbf16>, vector<32x384xbf16>, vector<32x384xbf16>, vector<32x384xbf16>, vector<32x384xbf16> -> vector<288x384xbf16>
    %c0_41 = arith.constant 0 : index
    %c0_42 = arith.constant 0 : index
    %45 = vector.load %arg4[%c0_41, %c0_42] : memref<32x288xbf16, #tpu.memory_space<vmem>>, vector<32x288xbf16>
    %cst_43 = arith.constant dense<0.000000e+00> : vector<32x384xf32>
    %46 = tpu.matmul %45, %44, %cst_43 {dimension_numbers = #tpu.dot_dimension_numbers<[1], [0], [0], [1], [0, 0, 1, 1], [], []>} : vector<32x288xbf16>, vector<288x384xbf16>, vector<32x384xf32> -> vector<32x384xf32>
    %c0_44 = arith.constant 0 : index
    %c0_45 = arith.constant 0 : index
    %47 = vector.load %arg5[%c0_44, %c0_45] : memref<32x1xf32, #tpu.memory_space<vmem>>, vector<32x1xf32>
    %48 = vector.broadcast %47 : vector<32x1xf32> to vector<32x384xf32>
    %49 = arith.addf %46, %48 : vector<32x384xf32>
    %c0_46 = arith.constant 0 : index
    %c0_47 = arith.constant 0 : index
    %c0_48 = arith.constant 0 : index
    %50 = vector.load %arg7[%c0_46, %c0_47, %c0_48] : memref<1x32x384xf32, #tpu.memory_space<vmem>>, vector<1x32x384xf32>
    %51 = vector.shape_cast %50 : vector<1x32x384xf32> to vector<32x384xf32>
    %52 = vector.shape_cast %49 : vector<32x384xf32> to vector<1x32x384xf32>
    tpu.vector_store %arg7[%c0_46, %c0_47, %c0_48], %52 {strides = array<i32>} : memref<1x32x384xf32, #tpu.memory_space<vmem>>, vector<1x32x384xf32>,
    return
  }
  func.func @transform_0(%arg0: i32) -> (i32, i32, i32) {
    %c0_i32 = arith.constant 0 : i32
    %c0_i32_0 = arith.constant 0 : i32
    %c0_i32_1 = arith.constant 0 : i32
    return %arg0, %c0_i32, %c0_i32_0 : i32, i32, i32
  }
  func.func @transform_1(%arg0: i32) -> (i32, i32) {
    %c0_i32 = arith.constant 0 : i32
    %c0_i32_0 = arith.constant 0 : i32
    %c0_i32_1 = arith.constant 0 : i32
    return %c0_i32, %c0_i32_0 : i32, i32
  }
  func.func @transform_2(%arg0: i32) -> (i32, i32) {
    %c0_i32 = arith.constant 0 : i32
    %c0_i32_0 = arith.constant 0 : i32
    %c0_i32_1 = arith.constant 0 : i32
    return %c0_i32, %c0_i32_0 : i32, i32
  }
  func.func @transform_3(%arg0: i32) -> (i32, i32) {
    %c0_i32 = arith.constant 0 : i32
    %c0_i32_0 = arith.constant 0 : i32
    %c0_i32_1 = arith.constant 0 : i32
    return %c0_i32, %c0_i32_0 : i32, i32
  }
  func.func @transform_4(%arg0: i32) -> (i32, i32) {
    %c0_i32 = arith.constant 0 : i32
    %c0_i32_0 = arith.constant 0 : i32
    %c0_i32_1 = arith.constant 0 : i32
    return %c0_i32, %c0_i32_0 : i32, i32
  }
  func.func @transform_5(%arg0: i32) -> (i32, i32) {
    %c0_i32 = arith.constant 0 : i32
    %c0_i32_0 = arith.constant 0 : i32
    %c0_i32_1 = arith.constant 0 : i32
    return %c0_i32, %c0_i32_0 : i32, i32
  }
  func.func @transform_6(%arg0: i32) -> (i32, i32, i32) {
    %c0_i32 = arith.constant 0 : i32
    %c0_i32_0 = arith.constant 0 : i32
    %c0_i32_1 = arith.constant 0 : i32
    return %arg0, %c0_i32, %c0_i32_0 : i32, i32, i32
  }
}

</mosaic_0001>

<bundles_post_ra>
// kernel: dip_forward.1
= control target key start
LH: loop header
LB: loop body
LE: loop exit
PB: predicated region body
PF: predicated region fallthrough
CT: control target
= control target key end

     0   :  { %s1647_s21 = smov 0   ;;  %s2281_s0 = inlined_call_operand.vmem [shape: bf16[2,16,512], index: 0, kind: input, shape index: {}]   ;;  %s2282_s1 = inlined_call_operand.vmem [shape: bf16[32,144], index: 1, kind: input, shape index: {}]   ;;  %s2283_s2 = inlined_call_operand.vmem [shape: f32[32,1], index: 2, kind: input, shape index: {}]   ;;  %s2284_s3 = inlined_call_operand.vmem [shape: bf16[32,288], index: 3, kind: input, shape index: {}]   ;;  %s2285_s4 = inlined_call_operand.vmem [shape: f32[32,1], index: 4, kind: input, shape index: {}]   ;;  %s2286_s5 = inlined_call_operand.vmem [shape: f32[1,384], index: 5, kind: input, shape index: {}]   ;;  %s2287_s6 = inlined_call_operand.vmem [shape: f32[2,32,384], index: 6, kind: output, shape index: {}]  }
   0x1 LB: > { %s1420_s22 = sadd.s32 4294967295, %s1600_s21   ;;  %p1424_p0 = scmp.ge.s32.totalorder %s1600_s21, 1  ;;  %s1600_s21 = sphi %s1647_s21, %s16_s21  }
   0x2   : > { %p212_p1 = scmp.lt.s32.totalorder %s1600_s21, 3 }
   0x4   : > { %p213_p2 = pnand %p1424_p0, %p212_p1 }
   0x5   : > { %p242_p3 = scmp.lt.s32.totalorder (!%p213_p2), %s1420_s22, 1  ;;  %v1602_v0 = vmov (!%p213_p2), 0   ;;  %s1603_s27 = smov (!%p213_p2), 127   ;;  %v1582_v6 = vld [vmem:[%s2282_s1 + $0x4] ss:$8 sps:$4 sm:$0xff] (!%p213_p2)   ;;  %vm459_vm0 = vcmask (!%p213_p2), 130048  }
   0x6   : > { %216 = sbr.rel (%p213_p2) target bundleno = 1038 (0x40e), region = 44  ;;  %519 = vmatprep.subr.bf16.mxu1 (!%p213_p2), %v1602_v0  ;;  %1532 = vset.pattern.permute.xlu1 (!%p213_p2), %v1602_v0  ;;  %s1604_s28 = smov (!%p213_p2), 126   ;;  %v417_v7 = vld [vmem:[%s2283_s2] sm:$0xff] (!%p213_p2)  ;;  %v418_v8 = vld [vmem:[%s2283_s2 + $0x8] sm:$0xff] (!%p213_p2)  ;;  %v420_v9 = vld [vmem:[%s2283_s2 + $0x18] sm:$0xff] (!%p213_p2)  ;;  %vm301_vm1 = vcmask (!%p213_p2), 1039360  }
   0x7   : > { %1531 = vset.pattern.permute.xlu0 (!%p213_p2), %v1602_v0  ;;  %s1605_s29 = smov (!%p213_p2), 110   ;;  %s1606_s30 = smov (!%p213_p2), 109   ;;  %1439 = vmatprep.mubr.msk.bf16.mxu0 (!%p213_p2), %vm459_vm0, %v1582_v6  ;;  %v419_v10 = vld [vmem:[%s2283_s2 + $0x10] sm:$0xff] (!%p213_p2)  ;;  %vm316_vm2 = vcmask (!%p213_p2), 1031168   ;;  %vm331_vm3 = vcmask (!%p213_p2), 900096   ;;  %vm346_vm4 = vcmask (!%p213_p2), 891904  }
   0x8   : > { %s1607_s7 = smov (!%p213_p2), 108   ;;  %s1608_s8 = smov (!%p213_p2), 92   ;;  %1441 = vmatprep.mubr.msk.bf16.mxu1 (!%p213_p2), %vm459_vm0, %v1582_v6  ;;  %vm361_vm5 = vcmask (!%p213_p2), 883712   ;;  %vm376_vm6 = vcmask (!%p213_p2), 752640   ;;  %vm391_vm7 = vcmask (!%p213_p2), 744448   ;;  %vm406_vm8 = vcmask (!%p213_p2), 736256  }
   0x9   : > { %s1609_s9 = smov (!%p213_p2), 91   ;;  %s1610_s12 = smov (!%p213_p2), 90   ;;  %v1585_v6 = vld [vmem:[%s2282_s1 + $0x10] ss:$8 sps:$4 sm:$0xff] (!%p213_p2)   ;;  %vm1033_vm9 = vcmask (!%p213_p2), 154624   ;;  %vm1142_vm10 = vcmask (!%p213_p2), 261120  }
   0xa   : > { %s1611_s13 = smov (!%p213_p2), 19  }
   0xd   : > { %s2289_s22 = smov (!%p242_p3, %s1420_s22), 1 }
   0xe   : > { %s1455_s23 = sshll.u32 %s2289_s22, 5  ;;  %s1512_s14 = smul.u32 96, %s2289_s22 }
   0xf   : > { %s246_s26 = scalar_lea.vmem %s2281_s0, %s1455_s23 }
  0x10   : > { %v1573_v1 = vld [vmem:[%s246_s26 + $0x4] ss:$16 sps:$4 sm:$0xff]   ;;  %v1575_v2 = vld [vmem:[%s246_s26] ss:$16 sps:$4 sm:$0xff]   ;;  %v1576_v3 = vld [vmem:[%s246_s26 + $0x8] ss:$16 sps:$4 sm:$0xff]  }
  0x11   : > { %295 = vrot.lane.b32.xlu0 %v1573_v1, %s1603_s27  ;;  %466 = vmatprep.subr.bf16.mxu0 %v1573_v1  ;;  %v1578_v4 = vld [vmem:[%s246_s26 + $0xc] ss:$16 sps:$4 sm:$0xff]   ;;  %v1579_v5 = vld [vmem:[%s246_s26 + $0x8] ss:$16 sps:$4 sm:$0xff]  }
  0x12   : > { %293 = vrot.lane.b32.xlu1 %v1575_v2, %s1603_s27  ;;  %467 = vmatpush1.bf16.msra.mxu0 %v1575_v2 }
  0x13   : > { %520 = vmatpush1.bf16.msra.mxu1 %v1579_v5  ;;  %v1583_v5 = vld [vmem:[%s2282_s1 + $0x14] ss:$8 sps:$4 sm:$0xff]  }
  0x14   : > { %521 = vmatprep.subr.bf16.mxu1 %v1602_v0 }
  0x15   : > { %297 = vrot.lane.b32.xlu0 %v1576_v3, %s1603_s27 }
  0x16   : > { %299 = vrot.lane.b32.xlu1 %v1578_v4, %s1603_s27 }
  0x19   : > { %310 = vrot.lane.b32.xlu0 %v1573_v1, %s1604_s28 }
  0x1a   : > { %312 = vrot.lane.b32.xlu1 %v1576_v3, %s1604_s28 }
  0x1d   : > { %308 = vrot.lane.b32.xlu0 %v1575_v2, %s1604_s28 }
  0x1e   : > { %314 = vrot.lane.b32.xlu1 %v1578_v4, %s1604_s28 }
  0x21   : > { %325 = vrot.lane.b32.xlu0 %v1573_v1, %s1605_s29 }
  0x22   : > { %327 = vrot.lane.b32.xlu1 %v1576_v3, %s1605_s29 }
  0x25   : > { %323 = vrot.lane.b32.xlu0 %v1575_v2, %s1605_s29 }
  0x26   : > { %329 = vrot.lane.b32.xlu1 %v1578_v4, %s1605_s29 }
  0x29   : > { %340 = vrot.lane.b32.xlu0 %v1573_v1, %s1606_s30 }
  0x2a   : > { %342 = vrot.lane.b32.xlu1 %v1576_v3, %s1606_s30 }
  0x2d   : > { %338 = vrot.lane.b32.xlu0 %v1575_v2, %s1606_s30 }
  0x2e   : > { %344 = vrot.lane.b32.xlu1 %v1578_v4, %s1606_s30 }
  0x31   : > { %355 = vrot.lane.b32.xlu0 %v1573_v1, %s1607_s7 }
  0x32   : > { %357 = vrot.lane.b32.xlu1 %v1576_v3, %s1607_s7 }
  0x35   : > { %353 = vrot.lane.b32.xlu0 %v1575_v2, %s1607_s7 }
  0x36   : > { %359 = vrot.lane.b32.xlu1 %v1578_v4, %s1607_s7 }
  0x39   : > { %370 = vrot.lane.b32.xlu0 %v1573_v1, %s1608_s8 }
  0x3a   : > { %372 = vrot.lane.b32.xlu1 %v1576_v3, %s1608_s8 }
  0x3d   : > { %368 = vrot.lane.b32.xlu0 %v1575_v2, %s1608_s8 }
  0x3e   : > { %374 = vrot.lane.b32.xlu1 %v1578_v4, %s1608_s8 }
  0x41   : > { %385 = vrot.lane.b32.xlu0 %v1573_v1, %s1609_s9 }
  0x42   : > { %387 = vrot.lane.b32.xlu1 %v1576_v3, %s1609_s9 }
  0x45   : > { %383 = vrot.lane.b32.xlu0 %v1575_v2, %s1609_s9 }
  0x46   : > { %389 = vrot.lane.b32.xlu1 %v1578_v4, %s1609_s9 }
  0x49   : > { %400 = vrot.lane.b32.xlu0 %v1573_v1, %s1610_s12 }
  0x4a   : > { %402 = vrot.lane.b32.xlu1 %v1576_v3, %s1610_s12  ;;  %v1580_v3 = vld [vmem:[%s2282_s1] ss:$8 sps:$4 sm:$0xff]  }
  0x4d   : > { %398 = vrot.lane.b32.xlu0 %v1575_v2, %s1610_s12 }
  0x4e   : > { %404 = vrot.lane.b32.xlu1 %v1578_v4, %s1610_s12 }
  0x51   : > { %423 = vperm.xlu0 %1531, %v417_v7   ;;  %v582_v7 = vlaneseq }
  0x52   : > { %428 = vperm.xlu1 %1532, %v418_v8  }
  0x53   : > { %v583_v8 = vshrl.u32 %v582_v7, 7 }
  0x55   : > { %438 = vperm.xlu0 %1531, %v420_v9   ;;  %v584_v9 = vsub.s32 0, %v583_v8 }
  0x56   : > { %433 = vperm.xlu1 %1532, %v419_v10   ;;  %v588_v10 = vsub.s32 1, %v583_v8 }
  0x59   : > { %1534 = vrot.lane.b32.xlu0 %v1602_v0, %s1603_s27 }
  0x5a   : > { %1539 = vrot.lane.b32.xlu1 %v1602_v0, %s1604_s28 }
  0x5d   : > { %1544 = vrot.lane.b32.xlu0 %v1602_v0, %s1605_s29 }
  0x5e   : > { %1549 = vrot.lane.b32.xlu1 %v1602_v0, %s1607_s7 }
  0x61   : > { %1554 = vrot.lane.b32.xlu0 %v1602_v0, %s1608_s8 }
  0x62   : > { %1559 = vrot.lane.b32.xlu1 %v1602_v0, %s1609_s9 }
  0x65   : > { %1569 = vrot.lane.b32.xlu0 %v1602_v0, %s1610_s12 }
  0x66   : > { %1564 = vrot.lane.b32.xlu1 %v1602_v0, %s1611_s13 }
  0x83   : > { %v296_v11 = vpop.permute.xlu0 %295 }
  0x84   : > { %v294_v12 = vpop.permute.xlu1 %293 }
  0x85   : > { %v302_v17 = vsel %vm301_vm1, %v294_v12, %v296_v11  ;;  %v592_v12 = vsub.s32 2, %v583_v8 }
  0x87   : > { %v298_v13 = vpop.permute.xlu0 %297 }
  0x88   : > { %v300_v14 = vpop.permute.xlu1 %299  ;;  %v303_v15 = vsel %vm301_vm1, %v296_v11, %v298_v13 }
  0x89   : > { %468 = vmatprep.subr.bf16.mxu0 %v303_v15  ;;  %v304_v16 = vsel %vm301_vm1, %v298_v13, %v300_v14  ;;  %v580_v15 = vld [vmem:[%s2286_s5] sm:$0x7] }
  0x8a   : > { %522 = vmatpush1.bf16.msra.mxu1 %v304_v16  ;;  %469 = vmatpush1.bf16.msra.mxu0 %v302_v17  ;;  %v585_v17 = vrot.slane %v580_v15, %v584_v9 }
  0x8b   : > { %v311_v18 = vpop.permute.xlu0 %310  ;;  %523 = vmatprep.subr.bf16.mxu1 %v1602_v0 }
  0x8c   : > { %v313_v19 = vpop.permute.xlu1 %312 }
  0x8d   : > { %v318_v20 = vsel %vm316_vm2, %v311_v18, %v313_v19 }
  0x8e   : > { %470 = vmatprep.subr.bf16.mxu0 %v318_v20 }
  0x8f   : > { %v309_v21 = vpop.permute.xlu0 %308 }
  0x90   : > { %v315_v22 = vpop.permute.xlu1 %314  ;;  %v317_v23 = vsel %vm316_vm2, %v309_v21, %v311_v18 }
  0x91   : > { %v319_v24 = vsel %vm316_vm2, %v313_v19, %v315_v22  ;;  %471 = vmatpush1.bf16.msra.mxu0 %v317_v23  ;;  %v589_v22 = vrot.slane %v580_v15, %v588_v10 }
  0x92   : > { %524 = vmatpush1.bf16.msra.mxu1 %v319_v24 }
  0x93   : > { %v326_v25 = vpop.permute.xlu0 %325  ;;  %525 = vmatprep.subr.bf16.mxu1 %v1602_v0 }
  0x94   : > { %v328_v26 = vpop.permute.xlu1 %327 }
  0x95   : > { %v333_v27 = vsel %vm331_vm3, %v326_v25, %v328_v26 }
  0x96   : > { %472 = vmatprep.subr.bf16.mxu0 %v333_v27 }
  0x97   : > { %v324_v28 = vpop.permute.xlu0 %323 }
  0x98   : > { %v330_v29 = vpop.permute.xlu1 %329  ;;  %v332_v30 = vsel %vm331_vm3, %v324_v28, %v326_v25 }
  0x99   : > { %v334_v31 = vsel %vm331_vm3, %v328_v26, %v330_v29  ;;  %473 = vmatpush1.bf16.msra.mxu0 %v332_v30  ;;  %v593_v26 = vrot.slane %v580_v15, %v592_v12 }
  0x9a   : > { %526 = vmatpush1.bf16.msra.mxu1 %v334_v31 }
  0x9b   : > { %v341_v32 = vpop.permute.xlu0 %340  ;;  %527 = vmatprep.subr.bf16.mxu1 %v1602_v0 }
  0x9c   : > { %v343_v33 = vpop.permute.xlu1 %342 }
  0x9d   : > { %v348_v34 = vsel %vm346_vm4, %v341_v32, %v343_v33 }
  0x9e   : > { %474 = vmatprep.subr.bf16.mxu0 %v348_v34 }
  0x9f   : > { %v339_v35 = vpop.permute.xlu0 %338 }
  0xa0   : > { %v345_v36 = vpop.permute.xlu1 %344  ;;  %v347_v37 = vsel %vm346_vm4, %v339_v35, %v341_v32 }
  0xa1   : > { %v349_v38 = vsel %vm346_vm4, %v343_v33, %v345_v36  ;;  %475 = vmatpush1.bf16.msra.mxu0 %v347_v37 }
  0xa2   : > { %528 = vmatpush1.bf16.msra.mxu1 %v349_v38 }
  0xa3   : > { %v356_v39 = vpop.permute.xlu0 %355  ;;  %529 = vmatprep.subr.bf16.mxu1 %v1602_v0 }
  0xa4   : > { %v358_v40 = vpop.permute.xlu1 %357 }
  0xa5   : > { %v363_v41 = vsel %vm361_vm5, %v356_v39, %v358_v40 }
  0xa6   : > { %476 = vmatprep.subr.bf16.mxu0 %v363_v41 }
  0xa7   : > { %v354_v42 = vpop.permute.xlu0 %353 }
  0xa8   : > { %v360_v43 = vpop.permute.xlu1 %359  ;;  %v362_v44 = vsel %vm361_vm5, %v354_v42, %v356_v39 }
  0xa9   : > { %v364_v45 = vsel %vm361_vm5, %v358_v40, %v360_v43  ;;  %477 = vmatpush1.bf16.msra.mxu0 %v362_v44 }
  0xaa   : > { %530 = vmatpush1.bf16.msra.mxu1 %v364_v45 }
  0xab   : > { %v371_v46 = vpop.permute.xlu0 %370  ;;  %531 = vmatprep.subr.bf16.mxu1 %v1602_v0 }
  0xac   : > { %v373_v47 = vpop.permute.xlu1 %372 }
  0xad   : > { %v378_v48 = vsel %vm376_vm6, %v371_v46, %v373_v47 }
  0xae   : > { %478 = vmatprep.subr.bf16.mxu0 %v378_v48 }
  0xaf   : > { %v369_v49 = vpop.permute.xlu0 %368 }
  0xb0   : > { %v375_v50 = vpop.permute.xlu1 %374  ;;  %v377_v51 = vsel %vm376_vm6, %v369_v49, %v371_v46 }
  0xb1   : > { %v379_v52 = vsel %vm376_vm6, %v373_v47, %v375_v50  ;;  %479 = vmatpush1.bf16.msra.mxu0 %v377_v51 }
  0xb2   : > { %532 = vmatpush1.bf16.msra.mxu1 %v379_v52 }
  0xb3   : > { %v386_v53 = vpop.permute.xlu0 %385  ;;  %533 = vmatprep.subr.bf16.mxu1 %v1602_v0 }
  0xb4   : > { %v388_v54 = vpop.permute.xlu1 %387 }
  0xb5   : > { %v393_v55 = vsel %vm391_vm7, %v386_v53, %v388_v54 }
  0xb6   : > { %480 = vmatprep.subr.bf16.mxu0 %v393_v55 }
  0xb7   : > { %v384_v56 = vpop.permute.xlu0 %383 }
  0xb8   : > { %v390_v57 = vpop.permute.xlu1 %389  ;;  %v392_v58 = vsel %vm391_vm7, %v384_v56, %v386_v53 }
  0xb9   : > { %v394_v59 = vsel %vm391_vm7, %v388_v54, %v390_v57  ;;  %481 = vmatpush1.bf16.msra.mxu0 %v392_v58 }
  0xba   : > { %534 = vmatpush1.bf16.msra.mxu1 %v394_v59 }
  0xbb   : > { %v401_v60 = vpop.permute.xlu0 %400  ;;  %535 = vmatprep.subr.bf16.mxu1 %v1602_v0 }
  0xbc   : > { %v403_v61 = vpop.permute.xlu1 %402 }
  0xbd   : > { %v408_v62 = vsel %vm406_vm8, %v401_v60, %v403_v61 }
  0xbe   : > { %482 = vmatprep.subr.bf16.mxu0 %v408_v62 }
  0xbf   : > { %v399_v63 = vpop.permute.xlu0 %398 }
  0xc0   : > { %v405_v1 = vpop.permute.xlu1 %404  ;;  %v407_v2 = vsel %vm406_vm8, %v399_v63, %v401_v60 }
  0xc1   : > { %483 = vmatpush1.bf16.msra.mxu0 %v407_v2  ;;  %v409_v4 = vsel %vm406_vm8, %v403_v61, %v405_v1 }
  0xc2   : > { %536 = vmatpush1.bf16.msra.mxu1 %v409_v4 }
  0xc4   : > { %499 = vmatmul.mubr.bf16.vlgmr.msra.gmra.mrb[0].mxu0 %v1580_v3 }
  0xc5   : > { %552 = vmatmul.mubr.bf16.vlgmr.msra.gmra.mrb[0].mxu1 %v1580_v3  ;;  %1440 = vmatprep.mubr.msk.bf16.mxu0 %vm459_vm0, %v1583_v5 }
  0xc6   : > { %1442 = vmatprep.mubr.msk.bf16.mxu1 %vm459_vm0, %v1583_v5 }
  0xcc   : > { %509 = vmatmul.mubr.bf16.gmra.mrb[4].mxu0 %v1585_v6 }
  0xcd   : > { %560 = vmatmul.mubr.bf16.gmra.mrb[4].mxu1 %v1585_v6 }
  0xce   : > { %1234 = vmatprep.mubr.bf16.mxu1 %v1602_v0 }
  0xd0   : > { %v424_v11 = vpop.permute.xlu0 %423 }
  0xd1   : > { %v429_v13 = vpop.permute.xlu1 %428 }
  0xd4   : > { %v439_v40 = vpop.permute.xlu0 %438 }
  0xd5   : > { %v434_v43 = vpop.permute.xlu1 %433 }
  0xd8   : > { %v1822_v15 = vpop.permute.xlu0 %1534 }
 0x197   : > { %v500_v14 = vpop.f32.mrb[0].mxu0 }
 0x198   : > { %v501_v16 = vadd.f32 %v500_v14, %v424_v11  ;;  %v553_v18 = vpop.f32.mrb[0].mxu1  ;;  %v502_v19 = vpop.f32.mrb[1].mxu0 }
 0x199   : > { %v554_v20 = vadd.f32 %v553_v18, %v424_v11  ;;  %v503_v21 = vadd.f32 %v502_v19, %v424_v11  ;;  %v555_v23 = vpop.f32.mrb[1].mxu1  ;;  %v504_v24 = vpop.f32.mrb[2].mxu0 }
 0x19a   : > { %v568_v25 = vmax.f32 %v501_v16, 0.0  ;;  %v505_v27 = vadd.f32 %v504_v24, %v429_v13  ;;  %v556_v28 = vpop.f32.mrb[2].mxu1  ;;  %v506_v29 = vpop.f32.mrb[3].mxu0 }
 0x19b   : > { %v570_v30 = vmax.f32 %v554_v20, 0.0  ;;  %v569_v31 = vmax.f32 %v503_v21, 0.0  ;;  %v557_v32 = vadd.f32 %v556_v28, %v429_v13  ;;  %v507_v33 = vadd.f32 %v506_v29, %v429_v13  ;;  %v558_v34 = vpop.f32.mrb[3].mxu1  ;;  %v1824_v16 = vpop.permute.xlu1 %1539 }
 0x19c   : > { %v597_v35 = vmul.f32 %v585_v17, %v568_v25  ;;  %v571_v36 = vmax.f32 %v505_v27, 0.0 }
 0x19d   : > { %v598_v37 = vmul.f32 %v589_v22, %v569_v31  ;;  %v573_v38 = vmax.f32 %v557_v32, 0.0  ;;  %v572_v39 = vmax.f32 %v507_v33, 0.0  ;;  %v599_v42 = vmul.f32 %v593_v26, %v570_v30 }
 0x19e   : > { %v600_v41 = vmul.f32 %v585_v17, %v571_v36  ;;  %v1536_v33 = vunpack.i.l.bf16 %v1822_v15 }
 0x19f   : > { %v602_v44 = vmul.f32 %v593_v26, %v573_v38  ;;  %v601_v45 = vmul.f32 %v589_v22, %v572_v39  ;;  %v510_v46 = vpop.f32.mrb[4].mxu0  ;;  %v1832_v18 = vpop.permute.xlu1 %1549 }
 0x1a0   : > { %v613_v47 = vpack.c.bf16 %v600_v41, %v597_v35  ;;  %v511_v48 = vadd.f32 %v510_v46, %v434_v43  ;;  %v561_v49 = vpop.f32.mrb[4].mxu1  ;;  %v512_v50 = vpop.f32.mrb[5].mxu0 }
 0x1a1   : > { %v615_v51 = vpack.c.bf16 %v602_v44, %v599_v42  ;;  %v614_v52 = vpack.c.bf16 %v601_v45, %v598_v37  ;;  %v562_v53 = vadd.f32 %v561_v49, %v434_v43  ;;  %v513_v54 = vadd.f32 %v512_v50, %v434_v43  ;;  %v563_v55 = vpop.f32.mrb[5].mxu1  ;;  %v514_v56 = vpop.f32.mrb[6].mxu0 }
 0x1a2   : > { %v574_v57 = vmax.f32 %v511_v48, 0.0  ;;  %v515_v58 = vadd.f32 %v514_v56, %v439_v40  ;;  %v564_v59 = vpop.f32.mrb[6].mxu1  ;;  %v516_v60 = vpop.f32.mrb[7].mxu0  ;;  %v1541_v37 = vunpack.i.l.bf16 %v1824_v16 }
 0x1a3   : > { %v576_v61 = vmax.f32 %v562_v53, 0.0  ;;  %v575_v62 = vmax.f32 %v513_v54, 0.0  ;;  %v565_v63 = vadd.f32 %v564_v59, %v439_v40  ;;  %677 = vrot.lane.b32.xlu0 %v615_v51, %s1604_s28  ;;  %655 = vrot.lane.b32.xlu1 %v615_v51, %s1603_s27  ;;  %v517_v1 = vadd.f32 %v516_v60, %v439_v40  ;;  %v566_v2 = vpop.f32.mrb[7].mxu1  ;;  %v1838_v20 = vpop.permute.xlu1 %1559 }
 0x1a4   : > { %v577_v3 = vmax.f32 %v515_v58, 0.0  ;;  %v603_v6 = vmul.f32 %v585_v17, %v574_v57 }
 0x1a5   : > { %v579_v4 = vmax.f32 %v565_v63, 0.0  ;;  %v578_v5 = vmax.f32 %v517_v1, 0.0  ;;  %v605_v7 = vmul.f32 %v593_v26, %v576_v61  ;;  %v604_v9 = vmul.f32 %v589_v22, %v575_v62 }
 0x1a6   : > { %v606_v8 = vmul.f32 %v585_v17, %v577_v3  ;;  %v1830_v17 = vpop.permute.xlu0 %1544 }
 0x1a7   : > { %v608_v10 = vmul.f32 %v593_v26, %v579_v4  ;;  %v607_v11 = vmul.f32 %v589_v22, %v578_v5  ;;  %809 = vrot.lane.b32.xlu0 %v615_v51, %s1610_s12  ;;  %699 = vrot.lane.b32.xlu1 %v615_v51, %s1605_s29  ;;  %v1844_v22 = vpop.permute.xlu1 %1564  ;;  %v1546_v41 = vunpack.i.l.bf16 %v1830_v17 }
 0x1a8   : > { %v616_v12 = vpack.c.bf16 %v606_v8, %v603_v6  ;;  %v1566_v58 = vunpack.i.l.bf16 %v1844_v22 }
 0x1a9   : > { %v618_v13 = vpack.c.bf16 %v608_v10, %v605_v7  ;;  %v617_v14 = vpack.c.bf16 %v607_v11, %v604_v9 }
 0x1aa   : > { %v1836_v19 = vpop.permute.xlu0 %1554 }
 0x1ab   : > { %719 = vrot.lane.b32.xlu0 %v615_v51, %s1606_s30  ;;  %765 = vrot.lane.b32.xlu1 %v615_v51, %s1608_s8  ;;  %v1556_v53 = vunpack.i.l.bf16 %v1836_v19 }
 0x1ae   : > { %v1842_v21 = vpop.permute.xlu0 %1569 }
 0x1af   : > { %743 = vrot.lane.b32.xlu0 %v615_v51, %s1607_s7  ;;  %651 = vrot.lane.b32.xlu1 %v613_v47, %s1603_s27 }
 0x1b3   : > { %787 = vrot.lane.b32.xlu0 %v615_v51, %s1609_s9  ;;  %695 = vrot.lane.b32.xlu1 %v613_v47, %s1605_s29 }
 0x1b7   : > { %895 = vrot.lane.b32.xlu0 %v615_v51, %s1611_s13  ;;  %739 = vrot.lane.b32.xlu1 %v613_v47, %s1607_s7 }
 0x1bb   : > { %673 = vrot.lane.b32.xlu0 %v613_v47, %s1604_s28  ;;  %783 = vrot.lane.b32.xlu1 %v613_v47, %s1609_s9 }
 0x1bf   : > { %805 = vrot.lane.b32.xlu0 %v613_v47, %s1610_s12  ;;  %675 = vrot.lane.b32.xlu1 %v614_v52, %s1604_s28 }
 0x1c3   : > { %715 = vrot.lane.b32.xlu0 %v613_v47, %s1606_s30  ;;  %807 = vrot.lane.b32.xlu1 %v614_v52, %s1610_s12 }
 0x1c7   : > { %761 = vrot.lane.b32.xlu0 %v613_v47, %s1608_s8  ;;  %717 = vrot.lane.b32.xlu1 %v614_v52, %s1606_s30 }
 0x1cb   : > { %891 = vrot.lane.b32.xlu0 %v613_v47, %s1611_s13  ;;  %741 = vrot.lane.b32.xlu1 %v614_v52, %s1607_s7  ;;  %v1551_v47 = vunpack.i.l.bf16 %v1832_v18 }
 0x1cf   : > { %653 = vrot.lane.b32.xlu0 %v614_v52, %s1603_s27  ;;  %785 = vrot.lane.b32.xlu1 %v614_v52, %s1609_s9 }
 0x1d3   : > { %697 = vrot.lane.b32.xlu0 %v614_v52, %s1605_s29  ;;  %893 = vrot.lane.b32.xlu1 %v614_v52, %s1611_s13 }
 0x1d7   : > { %763 = vrot.lane.b32.xlu0 %v614_v52, %s1608_s8  ;;  %663 = vrot.lane.b32.xlu1 %v618_v13, %s1603_s27 }
 0x1db   : > { %817 = vrot.lane.b32.xlu0 %v618_v13, %s1610_s12  ;;  %685 = vrot.lane.b32.xlu1 %v618_v13, %s1604_s28 }
 0x1df   : > { %751 = vrot.lane.b32.xlu0 %v618_v13, %s1607_s7  ;;  %707 = vrot.lane.b32.xlu1 %v618_v13, %s1605_s29 }
 0x1e3   : > { %795 = vrot.lane.b32.xlu0 %v618_v13, %s1609_s9  ;;  %725 = vrot.lane.b32.xlu1 %v618_v13, %s1606_s30 }
 0x1e7   : > { %903 = vrot.lane.b32.xlu0 %v618_v13, %s1611_s13  ;;  %773 = vrot.lane.b32.xlu1 %v618_v13, %s1608_s8 }
 0x1eb   : > { %813 = vrot.lane.b32.xlu0 %v616_v12, %s1610_s12  ;;  %659 = vrot.lane.b32.xlu1 %v616_v12, %s1603_s27 }
 0x1ef   : > { %721 = vrot.lane.b32.xlu0 %v616_v12, %s1606_s30  ;;  %681 = vrot.lane.b32.xlu1 %v616_v12, %s1604_s28 }
 0x1f3   : > { %769 = vrot.lane.b32.xlu0 %v616_v12, %s1608_s8  ;;  %703 = vrot.lane.b32.xlu1 %v616_v12, %s1605_s29 }
 0x1f7   : > { %791 = vrot.lane.b32.xlu0 %v616_v12, %s1609_s9  ;;  %747 = vrot.lane.b32.xlu1 %v616_v12, %s1607_s7 }
 0x1fb   : > { %899 = vrot.lane.b32.xlu0 %v616_v12, %s1611_s13  ;;  %815 = vrot.lane.b32.xlu1 %v617_v14, %s1610_s12 }
 0x1ff   : > { %661 = vrot.lane.b32.xlu0 %v617_v14, %s1603_s27  ;;  %749 = vrot.lane.b32.xlu1 %v617_v14, %s1607_s7 }
 0x203   : > { %683 = vrot.lane.b32.xlu0 %v617_v14, %s1604_s28  ;;  %793 = vrot.lane.b32.xlu1 %v617_v14, %s1609_s9  ;;  %s2264_s28 = scalar_lea.vmem %s2287_s6, %s1512_s14 }
 0x207   : > { %705 = vrot.lane.b32.xlu0 %v617_v14, %s1605_s29  ;;  %901 = vrot.lane.b32.xlu1 %v617_v14, %s1611_s13 }
 0x20b   : > { %723 = vrot.lane.b32.xlu0 %v617_v14, %s1606_s30 }
 0x20f   : > { %771 = vrot.lane.b32.xlu0 %v617_v14, %s1608_s8 }
 0x215   : > { %v678_v23 = vpop.permute.xlu0 %677  ;;  %v656_v24 = vpop.permute.xlu1 %655 }
 0x219   : > { %v1846_v25 = vpop.permute.xlu0 %809  ;;  %v1848_v26 = vpop.permute.xlu1 %699 }
 0x21d   : > { %v1850_v27 = vpop.permute.xlu0 %719  ;;  %v1852_v28 = vpop.permute.xlu1 %765 }
 0x21e   : > { %959 = vrot.lane.b32.xlu1 %v1850_v27, %s1611_s13  ;;  %v779_v56 = vsel %vm376_vm6, %v1852_v28, %v1556_v53 }
 0x221   : > { %v1856_v29 = vpop.permute.xlu0 %743  ;;  %v652_v30 = vpop.permute.xlu1 %651 }
 0x222   : > { %911 = vrot.lane.b32.xlu1 %v656_v24, %s1611_s13  ;;  %v665_v36 = vsel %vm301_vm1, %v1536_v33, %v652_v30  ;;  %v757_v50 = vsel %vm361_vm5, %v1856_v29, %v1551_v47 }
 0x225   : > { %v1859_v31 = vpop.permute.xlu0 %787  ;;  %v696_v32 = vpop.permute.xlu1 %695 }
 0x226   : > { %927 = vrot.lane.b32.xlu1 %v678_v23, %s1611_s13  ;;  %v709_v44 = vsel %vm331_vm3, %v1546_v41, %v696_v32 }
 0x229   : > { %v1863_v34 = vpop.permute.xlu0 %895  ;;  %v1865_v35 = vpop.permute.xlu1 %739 }
 0x22a   : > { %905 = vrot.lane.b32.xlu1 %v665_v36, %s1611_s13 }
 0x22d   : > { %v674_v38 = vpop.permute.xlu0 %673  ;;  %v1870_v39 = vpop.permute.xlu1 %783 }
 0x22e   : > { %v687_v40 = vsel %vm316_vm2, %v1541_v37, %v674_v38 }
 0x22f   : > { %921 = vrot.lane.b32.xlu1 %v687_v40, %s1611_s13 }
 0x231   : > { %v806_v42 = vpop.permute.xlu0 %805  ;;  %v676_v43 = vpop.permute.xlu1 %675 }
 0x232   : > { %1017 = vrot.lane.b32.xlu0 %v806_v42, %s1611_s13  ;;  %v688_v62 = vsel %vm316_vm2, %v674_v38, %v676_v43  ;;  %v689_v4 = vsel %vm316_vm2, %v676_v43, %v678_v23 }
 0x233   : > { %937 = vrot.lane.b32.xlu1 %v709_v44, %s1611_s13 }
 0x235   : > { %v716_v45 = vpop.permute.xlu0 %715  ;;  %v808_v46 = vpop.permute.xlu1 %807 }
 0x236   : > { %953 = vrot.lane.b32.xlu0 %v716_v45, %s1611_s13  ;;  %v822_v5 = vsel %vm406_vm8, %v808_v46, %v1846_v25  ;;  %v821_v8 = vsel %vm406_vm8, %v806_v42, %v808_v46  ;;  %v1542_v46 = vunpack.i.h.bf16 %v1824_v16 }
 0x239   : > { %v1880_v48 = vpop.permute.xlu0 %761  ;;  %v718_v49 = vpop.permute.xlu1 %717 }
 0x23a   : > { %975 = vrot.lane.b32.xlu0 %v757_v50, %s1611_s13  ;;  %v727_v13 = vsel %vm346_vm4, %v716_v45, %v718_v49 }
 0x23d   : > { %v892_v51 = vpop.permute.xlu0 %891  ;;  %v742_v52 = vpop.permute.xlu1 %741 }
 0x23e   : > { %969 = vrot.lane.b32.xlu0 %v1865_v35, %s1611_s13  ;;  %v1034_v1 = vsel %vm1033_vm9, %v1566_v58, %v892_v51  ;;  %v755_v36 = vsel %vm361_vm5, %v1865_v35, %v742_v52 }
 0x241   : > { %v654_v54 = vpop.permute.xlu0 %653  ;;  %v1888_v55 = vpop.permute.xlu1 %785 }
 0x242   : > { %991 = vrot.lane.b32.xlu0 %v779_v56, %s1611_s13  ;;  %v666_v57 = vsel %vm301_vm1, %v652_v30, %v654_v54  ;;  %v667_v61 = vsel %vm301_vm1, %v654_v54, %v656_v24  ;;  %v728_v24 = vsel %vm346_vm4, %v718_v49, %v1850_v27  ;;  %v756_v30 = vsel %vm361_vm5, %v742_v52, %v1856_v29 }
 0x243   : > { %907 = vrot.lane.b32.xlu1 %v666_v57, %s1611_s13  ;;  %v1537_v29 = vunpack.i.h.bf16 %v1822_v15  ;;  %v1552_v15 = vunpack.i.h.bf16 %v1832_v18 }
 0x245   : > { %v698_v59 = vpop.permute.xlu0 %697  ;;  %v1896_v60 = vpop.permute.xlu1 %893 }
 0x246   : > { %909 = vrot.lane.b32.xlu0 %v667_v61, %s1611_s13  ;;  %v1035_v63 = vsel %vm1033_vm9, %v892_v51, %v1896_v60  ;;  %v710_v9 = vsel %vm331_vm3, %v696_v32, %v698_v59  ;;  %v711_v10 = vsel %vm331_vm3, %v698_v59, %v1848_v26  ;;  %v1547_v51 = vunpack.i.h.bf16 %v1830_v17 }
 0x247   : > { %923 = vrot.lane.b32.xlu1 %v688_v62, %s1611_s13  ;;  %1149 = vmatprep.subr.bf16.mxu0 %v1035_v63  ;;  %v1567_v17 = vunpack.i.h.bf16 %v1844_v22 }
 0x248   : > { %1150 = vmatpush1.bf16.msra.mxu0 %v1034_v1 }
 0x249   : > { %v1905_v2 = vpop.permute.xlu0 %763  ;;  %v664_v3 = vpop.permute.xlu1 %663 }
 0x24a   : > { %925 = vrot.lane.b32.xlu0 %v689_v4, %s1611_s13  ;;  %v778_v27 = vsel %vm376_vm6, %v1905_v2, %v1852_v28 }
 0x24b   : > { %1021 = vrot.lane.b32.xlu1 %v822_v5, %s1611_s13  ;;  %v1561_v5 = vunpack.i.l.bf16 %v1838_v20 }
 0x24d   : > { %v1912_v6 = vpop.permute.xlu0 %817  ;;  %v1914_v7 = vpop.permute.xlu1 %685 }
 0x24e   : > { %1019 = vrot.lane.b32.xlu0 %v821_v8, %s1611_s13 }
 0x24f   : > { %939 = vrot.lane.b32.xlu1 %v710_v9, %s1611_s13  ;;  %v801_v9 = vsel %vm391_vm7, %v1859_v31, %v1561_v5 }
 0x251   : > { %v1922_v11 = vpop.permute.xlu0 %751  ;;  %v1924_v12 = vpop.permute.xlu1 %707 }
 0x252   : > { %941 = vrot.lane.b32.xlu0 %v711_v10, %s1611_s13  ;;  %v760_v45 = vsel %vm361_vm5, %v1922_v11, %v1552_v15 }
 0x253   : > { %955 = vrot.lane.b32.xlu1 %v727_v13, %s1611_s13  ;;  %v777_v13 = vsel %vm376_vm6, %v1880_v48, %v1905_v2 }
 0x255   : > { %v1929_v14 = vpop.permute.xlu0 %795  ;;  %v1931_v23 = vpop.permute.xlu1 %725 }
 0x256   : > { %957 = vrot.lane.b32.xlu0 %v728_v24, %s1611_s13 }
 0x257   : > { %973 = vrot.lane.b32.xlu1 %v756_v30, %s1611_s13 }
 0x259   : > { %v904_v32 = vpop.permute.xlu0 %903  ;;  %v1939_v33 = vpop.permute.xlu1 %773 }
 0x25a   : > { %919 = vrot.lane.b32.xlu0 %v664_v3, %s1611_s13 }
 0x25b   : > { %971 = vrot.lane.b32.xlu1 %v755_v36, %s1611_s13 }
 0x25d   : > { %v814_v37 = vpop.permute.xlu0 %813  ;;  %v660_v38 = vpop.permute.xlu1 %659 }
 0x25e   : > { %1025 = vrot.lane.b32.xlu0 %v814_v37, %s1611_s13  ;;  %v668_v40 = vsel %vm301_vm1, %v1537_v29, %v660_v38 }
 0x25f   : > { %989 = vrot.lane.b32.xlu1 %v778_v27, %s1611_s13  ;;  %v799_v27 = vsel %vm391_vm7, %v1870_v39, %v1888_v55 }
 0x261   : > { %v1952_v41 = vpop.permute.xlu0 %721  ;;  %v682_v42 = vpop.permute.xlu1 %681 }
 0x262   : > { %913 = vrot.lane.b32.xlu0 %v668_v40, %s1611_s13  ;;  %v690_v50 = vsel %vm316_vm2, %v1542_v46, %v682_v42 }
 0x263   : > { %967 = vrot.lane.b32.xlu1 %v1931_v23, %s1611_s13 }
 0x265   : > { %v1957_v35 = vpop.permute.xlu0 %769  ;;  %v704_v43 = vpop.permute.xlu1 %703 }
 0x266   : > { %v712_v53 = vsel %vm331_vm3, %v1547_v51, %v704_v43 }
 0x267   : > { %961 = vrot.lane.b32.xlu1 %v1952_v41, %s1611_s13 }
 0x269   : > { %v1962_v28 = vpop.permute.xlu0 %791  ;;  %v1964_v44 = vpop.permute.xlu1 %747 }
 0x26b   : > { %983 = vrot.lane.b32.xlu1 %v760_v45, %s1611_s13  ;;  %v835_v45 = vld [vmem:[%s2285_s4] sm:$0xff] }
 0x26d   : > { %v900_v47 = vpop.permute.xlu0 %899  ;;  %v816_v49 = vpop.permute.xlu1 %815 }
 0x26e   : > { %v824_v61 = vsel %vm406_vm8, %v814_v37, %v816_v49  ;;  %v825_v22 = vsel %vm406_vm8, %v816_v49, %v1912_v6 }
 0x26f   : > { %929 = vrot.lane.b32.xlu1 %v690_v50, %s1611_s13 }
 0x271   : > { %v662_v18 = vpop.permute.xlu0 %661  ;;  %v750_v52 = vpop.permute.xlu1 %749 }
 0x272   : > { %v669_v54 = vsel %vm301_vm1, %v660_v38, %v662_v18  ;;  %v670_v57 = vsel %vm301_vm1, %v662_v18, %v664_v3  ;;  %v1037_v3 = vsel %vm1033_vm9, %v1567_v17, %v900_v47  ;;  %v758_v37 = vsel %vm361_vm5, %v1964_v44, %v750_v52  ;;  %v836_v18 = vld [vmem:[%s2285_s4 + $0x8] sm:$0xff] }
 0x273   : > { %915 = vrot.lane.b32.xlu0 %v669_v54, %s1611_s13  ;;  %945 = vrot.lane.b32.xlu1 %v712_v53, %s1611_s13 }
 0x275   : > { %v684_v56 = vpop.permute.xlu0 %683  ;;  %v1977_v16 = vpop.permute.xlu1 %793 }
 0x276   : > { %v692_v58 = vsel %vm316_vm2, %v684_v56, %v1914_v7  ;;  %v691_v62 = vsel %vm316_vm2, %v682_v42, %v684_v56 }
 0x277   : > { %933 = vrot.lane.b32.xlu0 %v692_v58, %s1611_s13  ;;  %917 = vrot.lane.b32.xlu1 %v670_v57, %s1611_s13 }
 0x279   : > { %v902_v59 = vpop.permute.xlu1 %901  ;;  %v706_v4 = vpop.permute.xlu0 %705 }
 0x27a   : > { %v1988_v63 = vsel %vm1033_vm9, %v902_v59, %v904_v32  ;;  %v1038_v1 = vsel %vm1033_vm9, %v900_v47, %v902_v59  ;;  %v713_v8 = vsel %vm331_vm3, %v704_v43, %v706_v4  ;;  %v714_v24 = vsel %vm331_vm3, %v706_v4, %v1924_v12 }
 0x27b   : > { %931 = vrot.lane.b32.xlu1 %v691_v62, %s1611_s13  ;;  %1027 = vrot.lane.b32.xlu0 %v824_v61, %s1611_s13  ;;  %v800_v32 = vsel %vm391_vm7, %v1888_v55, %v1859_v31  ;;  %v1562_v31 = vunpack.i.h.bf16 %v1838_v20  ;;  %v2056_v20 = vld [vmem:[%s2284_s3 + $0x4] ss:$12 sps:$4 sm:$0xff]   ;;  %v803_v43 = vsel %vm391_vm7, %v1977_v16, %v1929_v14  ;;  %v1572_v47 = vunpack.i.h.bf16 %v1842_v21 }
 0x27c   : > { %1151 = vmatprep.subr.bf16.mxu0 %v1038_v1  ;;  %1181 = vmatprep.mubr.bf16.mxu0 %v2056_v20 }
 0x27d   : > { %1152 = vmatpush1.bf16.msra.mxu0 %v1037_v3  ;;  %v724_v30 = vpop.permute.xlu0 %723 }
 0x27f   : > { %1029 = vrot.lane.b32.xlu1 %v825_v22, %s1611_s13  ;;  %935 = vrot.lane.b32.xlu0 %v1914_v7, %s1611_s13  ;;  %v1557_v7 = vunpack.i.h.bf16 %v1836_v19  ;;  %v730_v19 = vsel %vm346_vm4, %v724_v30, %v1931_v23  ;;  %v804_v23 = vsel %vm391_vm7, %v1929_v14, %v1562_v31 }
 0x281   : > { %v782_v10 = vsel %vm376_vm6, %v1939_v33, %v1557_v7 }
 0x283   : > { %977 = vrot.lane.b32.xlu1 %v1964_v44, %s1611_s13  ;;  %985 = vrot.lane.b32.xlu0 %v1880_v48, %s1611_s13  ;;  %v729_v48 = vsel %vm346_vm4, %v1952_v41, %v724_v30  ;;  %v1571_v41 = vunpack.i.l.bf16 %v1842_v21 }
 0x285   : > { %v823_v15 = vsel %vm406_vm8, %v1846_v25, %v1571_v41  ;;  %v837_v25 = vld [vmem:[%s2285_s4 + $0x10] sm:$0xff] }
 0x287   : > { %947 = vrot.lane.b32.xlu1 %v713_v8, %s1611_s13  ;;  %1007 = vrot.lane.b32.xlu0 %v801_v9, %s1611_s13 }
 0x28b   : > { %999 = vrot.lane.b32.xlu1 %v782_v10, %s1611_s13  ;;  %951 = vrot.lane.b32.xlu0 %v1924_v12, %s1611_s13  ;;  %v759_v12 = vsel %vm361_vm5, %v750_v52, %v1922_v11 }
 0x28f   : > { %987 = vrot.lane.b32.xlu1 %v777_v13, %s1611_s13  ;;  %949 = vrot.lane.b32.xlu0 %v714_v24, %s1611_s13 }
 0x290   : > { %v2027_v36 = vpop.permute.xlu1 %959 }
 0x293   : > { %1005 = vrot.lane.b32.xlu1 %v800_v32, %s1611_s13  ;;  %965 = vrot.lane.b32.xlu0 %v730_v19, %s1611_s13 }
 0x294   : > { %v912_v2 = vpop.permute.xlu1 %911 }
 0x297   : > { %943 = vrot.lane.b32.xlu1 %v1848_v26, %s1611_s13  ;;  %963 = vrot.lane.b32.xlu0 %v729_v48, %s1611_s13  ;;  %v772_v26 = vpop.permute.xlu0 %771 }
 0x298   : > { %v928_v38 = vpop.permute.xlu1 %927  ;;  %v781_v11 = vsel %vm376_vm6, %v772_v26, %v1939_v33  ;;  %v802_v33 = vsel %vm391_vm7, %v1962_v28, %v1977_v16  ;;  %v780_v55 = vsel %vm376_vm6, %v1957_v35, %v772_v26 }
 0x29b   : > { %993 = vrot.lane.b32.xlu1 %v1957_v35, %s1611_s13  ;;  %981 = vrot.lane.b32.xlu0 %v759_v12, %s1611_s13 }
 0x29c   : > { %v906_v40 = vpop.permute.xlu1 %905 }
 0x29f   : > { %1015 = vrot.lane.b32.xlu1 %v804_v23, %s1611_s13  ;;  %979 = vrot.lane.b32.xlu0 %v758_v37, %s1611_s13 }
 0x2a1   : > { %v2074_v44 = vpop.permute.xlu1 %921 }
 0x2a3   : > { %1003 = vrot.lane.b32.xlu1 %v799_v27, %s1611_s13  ;;  %997 = vrot.lane.b32.xlu0 %v781_v11, %s1611_s13 }
 0x2a4   : > { %v1018_v29 = vpop.permute.xlu0 %1017 }
 0x2a5   : > { %v2088_v46 = vpop.permute.xlu1 %937 }
 0x2a7   : > { %995 = vrot.lane.b32.xlu0 %v780_v55, %s1611_s13  ;;  %1011 = vrot.lane.b32.xlu1 %v802_v33, %s1611_s13 }
 0x2a8   : > { %v954_v42 = vpop.permute.xlu0 %953 }
 0x2ab   : > { %1013 = vrot.lane.b32.xlu0 %v803_v43, %s1611_s13  ;;  %1023 = vrot.lane.b32.xlu1 %v823_v15, %s1611_s13 }
 0x2ac   : > { %v2078_v35 = vpop.permute.xlu0 %975 }
 0x2af   : > { %1001 = vrot.lane.b32.xlu0 %v1870_v39, %s1611_s13  ;;  %841 = vperm.xlu1 %1532, %v835_v45   ;;  %v826_v39 = vsel %vm406_vm8, %v1912_v6, %v1572_v47  ;;  %v838_v6 = vld [vmem:[%s2285_s4 + $0x18] sm:$0xff] }
 0x2b0   : > { %v970_v14 = vpop.permute.xlu0 %969 }
 0x2b3   : > { %1009 = vrot.lane.b32.xlu0 %v1962_v28, %s1611_s13  ;;  %851 = vperm.xlu1 %1532, %v837_v25  }
 0x2b4   : > { %v2093_v49 = vpop.permute.xlu0 %991 }
 0x2b5   : > { %v908_v50 = vpop.permute.xlu1 %907 }
 0x2b6   : > { %v1040_v21 = vsel %vm1033_vm9, %v906_v40, %v908_v50 }
 0x2b7   : > { %1031 = vrot.lane.b32.xlu0 %v826_v39, %s1611_s13 }
 0x2b8   : > { %v910_v51 = vpop.permute.xlu0 %909 }
 0x2b9   : > { %v2102_v52 = vsel %vm1033_vm9, %v910_v51, %v912_v2  ;;  %v924_v28 = vpop.permute.xlu1 %923  ;;  %v1041_v53 = vsel %vm1033_vm9, %v908_v50, %v910_v51  ;;  %v2183_v50 = vld [vmem:[%s2284_s3 + $0x20] ss:$12 sps:$4 sm:$0xff]  }
 0x2ba   : > { %1153 = vmatprep.subr.bf16.mxu0 %v1041_v53  ;;  %v1046_v11 = vsel %vm1033_vm9, %v2074_v44, %v924_v28 }
 0x2bb   : > { %846 = vperm.xlu0 %1531, %v836_v18   ;;  %1154 = vmatpush1.bf16.msra.mxu0 %v1040_v21 }
 0x2bc   : > { %v926_v54 = vpop.permute.xlu0 %925 }
 0x2bd   : > { %v2110_v56 = vsel %vm1033_vm9, %v926_v54, %v928_v38  ;;  %v2112_v16 = vpop.permute.xlu1 %1021  ;;  %v1047_v37 = vsel %vm1033_vm9, %v924_v28, %v926_v54 }
 0x2bf   : > { %856 = vperm.xlu0 %1531, %v838_v6  }
 0x2c0   : > { %v1020_v57 = vpop.permute.xlu0 %1019 }
 0x2c1   : > { %v1082_v58 = vsel %vm1033_vm9, %v1018_v29, %v1020_v57  ;;  %v940_v17 = vpop.permute.xlu1 %939  ;;  %v1083_v59 = vsel %vm1033_vm9, %v1020_v57, %v2112_v16 }
 0x2c2   : > { %1202 = vmatprep.subr.bf16.mxu1 %v1083_v59  ;;  %v1052_v25 = vsel %vm1033_vm9, %v2088_v46, %v940_v17 }
 0x2c3   : > { %1203 = vmatpush1.bf16.msra.mxu1 %v1082_v58 }
 0x2c4   : > { %v2123_v1 = vpop.permute.xlu0 %941 }
 0x2c5   : > { %v2117_v61 = vpop.permute.xlu1 %955  ;;  %v1053_v43 = vsel %vm1033_vm9, %v940_v17, %v2123_v1 }
 0x2c6   : > { %v2121_v62 = vsel %vm1033_vm9, %v954_v42, %v2117_v61  ;;  %v2164_v42 = vld [vmem:[%s2284_s3 + $0x8] ss:$12 sps:$4 sm:$0xff]  }
 0x2c8   : > { %v958_v5 = vpop.permute.xlu0 %957 }
 0x2c9   : > { %v2125_v3 = vpop.permute.xlu1 %973  ;;  %v1060_v15 = vsel %vm1033_vm9, %v958_v5, %v2027_v36  ;;  %v1059_v18 = vsel %vm1033_vm9, %v2117_v61, %v958_v5 }
 0x2cc   : > { %v2135_v9 = vpop.permute.xlu0 %919 }
 0x2cd   : > { %v2127_v22 = vpop.permute.xlu1 %971 }
 0x2ce   : > { %v2131_v4 = vsel %vm1033_vm9, %v970_v14, %v2127_v22  ;;  %v1036_v14 = vsel %vm1033_vm9, %v1896_v60, %v1863_v34 }
 0x2d0   : > { %v1026_v13 = vpop.permute.xlu0 %1025 }
 0x2d1   : > { %v2133_v8 = vpop.permute.xlu1 %989 }
 0x2d4   : > { %v914_v30 = vpop.permute.xlu0 %913 }
 0x2d5   : > { %v968_v7 = vpop.permute.xlu1 %967 }
 0x2d9   : > { %v2137_v10 = vpop.permute.xlu1 %961 }
 0x2dd   : > { %v2139_v24 = vpop.permute.xlu1 %983 }
 0x2e1   : > { %v930_v19 = vpop.permute.xlu1 %929 }
 0x2e5   : > { %v916_v32 = vpop.permute.xlu0 %915  ;;  %v946_v48 = vpop.permute.xlu1 %945 }
 0x2e6   : > { %v1043_v23 = vsel %vm1033_vm9, %v914_v30, %v916_v32 }
 0x2e9   : > { %v2141_v2 = vpop.permute.xlu0 %933  ;;  %v2143_v12 = vpop.permute.xlu1 %917 }
 0x2ea   : > { %v1044_v31 = vsel %vm1033_vm9, %v916_v32, %v2143_v12  ;;  %v1045_v61 = vsel %vm1033_vm9, %v2143_v12, %v2135_v9 }
 0x2eb   : > { %1155 = vmatprep.subr.bf16.mxu0 %v1044_v31 }
 0x2ec   : > { %1156 = vmatpush1.bf16.msra.mxu0 %v1043_v23 }
 0x2ed   : > { %v1028_v26 = vpop.permute.xlu0 %1027  ;;  %1157 = vmatprep.subr.bf16.mxu0 %v1047_v37  ;;  %v932_v38 = vpop.permute.xlu1 %931  ;;  %v1588_v37 = vld [vmem:[%s2284_s3] ss:$12 sps:$4 sm:$0xff]  }
 0x2ee   : > { %v1050_v27 = vsel %vm1033_vm9, %v932_v38, %v2141_v2  ;;  %v1085_v55 = vsel %vm1033_vm9, %v1026_v13, %v1028_v26  ;;  %v1049_v41 = vsel %vm1033_vm9, %v930_v19, %v932_v38  ;;  %v1591_v38 = vld [vmem:[%s2284_s3 + $0x1c] ss:$12 sps:$4 sm:$0xff]  }
 0x2f0   : > { %1158 = vmatpush1.bf16.msra.mxu0 %v1046_v11 }
 0x2f1   : > { %v2153_v29 = vpop.permute.xlu0 %935  ;;  %1159 = vmatprep.subr.bf16.mxu0 %v1050_v27  ;;  %v2155_v40 = vpop.permute.xlu1 %1029 }
 0x2f2   : > { %v1086_v33 = vsel %vm1033_vm9, %v1028_v26, %v2155_v40 }
 0x2f3   : > { %1204 = vmatprep.subr.bf16.mxu1 %v1086_v33 }
 0x2f4   : > { %1160 = vmatpush1.bf16.msra.mxu0 %v1049_v41  ;;  %1205 = vmatpush1.bf16.msra.mxu1 %v1085_v55 }
 0x2f5   : > { %v2170_v44 = vpop.permute.xlu0 %985  ;;  %1161 = vmatprep.subr.bf16.mxu0 %v1053_v43  ;;  %1456 = vmatprep.subr.bf16.mxu1 %v1060_v15  ;;  %v978_v45 = vpop.permute.xlu1 %977 }
 0x2f7   : > { %1449 = vmatmul.mubr.msk.bf16.vlgmr.msra.gmra.mrb[8].mxu1 %vm1142_vm10, %v2164_v42 }
 0x2f8   : > { %1162 = vmatpush1.bf16.msra.mxu0 %v1052_v25  ;;  %1457 = vmatpush3.bf16.msra.mxu1 %v1036_v14 }
 0x2f9   : > { %v1008_v47 = vpop.permute.xlu0 %1007  ;;  %v948_v36 = vpop.permute.xlu1 %947  ;;  %1244 = vmatprep.mubr.bf16.mxu1 %v1602_v0 }
 0x2fa   : > { %v1055_v0 = vsel %vm1033_vm9, %v946_v48, %v948_v36 }
 0x2fd   : > { %v2185_v39 = vpop.permute.xlu0 %951  ;;  %v1000_v34 = vpop.permute.xlu1 %999 }
 0x2ff   : > { %1450 = vmatmul.mubr.msk.bf16.gmra.mrb[12].mxu1 %vm1142_vm10, %v2183_v50 }
 0x300   : > { %1287 = vmatprep.mubr.bf16.mxu1 %v2056_v20  ;;  %v1066_v20 = vsel %vm1033_vm9, %v2125_v3, %v2078_v35 }
 0x301   : > { %v2190_v60 = vpop.permute.xlu0 %949  ;;  %v988_v46 = vpop.permute.xlu1 %987 }
 0x302   : > { %v1056_v51 = vsel %vm1033_vm9, %v948_v36, %v2190_v60  ;;  %v1071_v9 = vsel %vm1033_vm9, %v988_v46, %v2133_v8  ;;  %v1070_v13 = vsel %vm1033_vm9, %v2170_v44, %v988_v46  ;;  %v1057_v23 = vsel %vm1033_vm9, %v2190_v60, %v2185_v39 }
 0x303   : > { %1163 = vmatprep.subr.bf16.mxu0 %v1056_v51 }
 0x304   : > { %1164 = vmatpush1.bf16.msra.mxu0 %v1055_v0 }
 0x305   : > { %v966_v28 = vpop.permute.xlu0 %965  ;;  %1165 = vmatprep.subr.bf16.mxu0 %v1059_v18  ;;  %v1006_v53 = vpop.permute.xlu1 %1005 }
 0x306   : > { %v1063_v21 = vsel %vm1033_vm9, %v966_v28, %v968_v7 }
 0x307   : > { %1458 = vmatprep.subr.bf16.mxu1 %v1063_v21 }
 0x308   : > { %1166 = vmatpush1.bf16.msra.mxu0 %v2121_v62  ;;  %1459 = vmatpush3.bf16.msra.mxu1 %v1988_v63  ;;  %v1065_v63 = vsel %vm1033_vm9, %v2127_v22, %v2125_v3 }
 0x309   : > { %v964_v54 = vpop.permute.xlu0 %963  ;;  %1460 = vmatprep.subr.bf16.mxu1 %v1066_v20  ;;  %v944_v6 = vpop.permute.xlu1 %943 }
 0x30a   : > { %v1061_v57 = vsel %vm1033_vm9, %v2137_v10, %v964_v54  ;;  %v1062_v58 = vsel %vm1033_vm9, %v964_v54, %v966_v28  ;;  %v1054_v32 = vsel %vm1033_vm9, %v2123_v1, %v944_v6 }
 0x30b   : > { %1167 = vmatprep.subr.bf16.mxu0 %v1062_v58 }
 0x30c   : > { %1168 = vmatpush1.bf16.msra.mxu0 %v1061_v57  ;;  %1461 = vmatpush3.bf16.msra.mxu1 %v2102_v52  ;;  %v1072_v52 = vsel %vm1033_vm9, %v2133_v8, %v2093_v49  ;;  %v1051_v49 = vsel %vm1033_vm9, %v2141_v2, %v2153_v29 }
 0x30d   : > { %v982_v17 = vpop.permute.xlu0 %981  ;;  %1169 = vmatprep.subr.bf16.mxu0 %v1065_v63  ;;  %v994_v59 = vpop.permute.xlu1 %993 }
 0x30e   : > { %v1069_v35 = vsel %vm1033_vm9, %v982_v17, %v2139_v24 }
 0x30f   : > { %1462 = vmatprep.subr.bf16.mxu1 %v1069_v35 }
 0x310   : > { %1170 = vmatpush1.bf16.msra.mxu0 %v2131_v4  ;;  %1463 = vmatpush3.bf16.msra.mxu1 %v1045_v61 }
 0x311   : > { %v980_v62 = vpop.permute.xlu0 %979  ;;  %1464 = vmatprep.subr.bf16.mxu1 %v1072_v52  ;;  %v1016_v3 = vpop.permute.xlu1 %1015 }
 0x312   : > { %v1067_v22 = vsel %vm1033_vm9, %v978_v45, %v980_v62  ;;  %v1068_v5 = vsel %vm1033_vm9, %v980_v62, %v982_v17 }
 0x313   : > { %1171 = vmatprep.subr.bf16.mxu0 %v1068_v5 }
 0x314   : > { %1172 = vmatpush1.bf16.msra.mxu0 %v1067_v22  ;;  %1465 = vmatpush3.bf16.msra.mxu1 %v2110_v56  ;;  %v1078_v56 = vsel %vm1033_vm9, %v1006_v53, %v1008_v47 }
 0x315   : > { %v998_v4 = vpop.permute.xlu0 %997  ;;  %1173 = vmatprep.subr.bf16.mxu0 %v1071_v9  ;;  %v1004_v7 = vpop.permute.xlu1 %1003 }
 0x316   : > { %v1075_v10 = vsel %vm1033_vm9, %v998_v4, %v1000_v34  ;;  %v1077_v48 = vsel %vm1033_vm9, %v1004_v7, %v1006_v53 }
 0x317   : > { %1466 = vmatprep.subr.bf16.mxu1 %v1075_v10 }
 0x318   : > { %1174 = vmatpush1.bf16.msra.mxu0 %v1070_v13  ;;  %1467 = vmatpush3.bf16.msra.mxu1 %v1051_v49 }
 0x319   : > { %v996_v24 = vpop.permute.xlu0 %995  ;;  %1468 = vmatprep.subr.bf16.mxu1 %v1078_v56  ;;  %v1012_v8 = vpop.permute.xlu1 %1011 }
 0x31a   : > { %v1073_v30 = vsel %vm1033_vm9, %v994_v59, %v996_v24  ;;  %v1074_v19 = vsel %vm1033_vm9, %v996_v24, %v998_v4 }
 0x31b   : > { %1175 = vmatprep.subr.bf16.mxu0 %v1074_v19 }
 0x31c   : > { %1176 = vmatpush1.bf16.msra.mxu0 %v1073_v30  ;;  %1469 = vmatpush3.bf16.msra.mxu1 %v1054_v32 }
 0x31d   : > { %v1014_v2 = vpop.permute.xlu0 %1013  ;;  %1177 = vmatprep.subr.bf16.mxu0 %v1077_v48  ;;  %v1024_v12 = vpop.permute.xlu1 %1023 }
 0x31e   : > { %v1081_v31 = vsel %vm1033_vm9, %v1014_v2, %v1016_v3  ;;  %v1084_v1 = vsel %vm1033_vm9, %v2112_v16, %v1024_v12  ;;  %v1080_v27 = vsel %vm1033_vm9, %v1012_v8, %v1014_v2  ;;  %v1593_v16 = vld [vmem:[%s2284_s3 + $0x18] ss:$12 sps:$4 sm:$0xff]  }
 0x31f   : > { %1470 = vmatprep.subr.bf16.mxu1 %v1081_v31 }
 0x320   : > { %1471 = vmatpush3.bf16.msra.mxu1 %v1057_v23 }
 0x321   : > { %v1002_v26 = vpop.permute.xlu0 %1001  ;;  %1488 = vmatprep.subr.bf16.mxu1 %v1084_v1 }
 0x322   : > { %v1076_v11 = vsel %vm1033_vm9, %v1002_v26, %v1004_v7 }
 0x323   : > { %1178 = vmatpush1.bf16.msra.mxu0 %v1076_v11  ;;  %1288 = vmatmul.mubr.bf16.vlgmr.msra.gmra.mrb[16].mxu1 %v1588_v37 }
 0x324   : > { %1179 = vmatprep.subr.bf16.mxu0 %v1080_v27  ;;  %1489 = vmatpush3.bf16.msra.mxu1 %v1084_v1 }
 0x325   : > { %v1010_v29 = vpop.permute.xlu0 %1009  ;;  %1295 = vmatprep.mubr.bf16.mxu1 %v1591_v38 }
 0x326   : > { %v1079_v33 = vsel %vm1033_vm9, %v1010_v29, %v1012_v8 }
 0x327   : > { %1180 = vmatpush1.bf16.msra.mxu0 %v1079_v33 }
 0x329   : > { %v1032_v55 = vpop.permute.xlu0 %1031 }
 0x32a   : > { %1182 = vmatmul.mubr.bf16.vlgmr.msra.gmra.mrb[8].mxu0 %v1588_v37  ;;  %v1087_v41 = vsel %vm1033_vm9, %v2155_v40, %v1032_v55 }
 0x32b   : > { %1296 = vmatmul.mubr.bf16.gmra.mrb[20].mxu1 %v1593_v16  ;;  %1490 = vmatprep.subr.bf16.mxu1 %v1087_v41 }
 0x32c   : > { %1491 = vmatpush3.bf16.msra.mxu1 %v1087_v41  ;;  %1191 = vmatprep.mubr.bf16.mxu0 %v1591_v38 }
 0x32d   : > { %1492 = vmatprep.mubr.msk.bf16.mxu1 %vm1142_vm10, %v2164_v42 }
 0x32e   : > { %v842_v42 = vpop.permute.xlu1 %841 }
 0x332   : > { %1192 = vmatmul.mubr.bf16.gmra.mrb[12].mxu0 %v1593_v16  ;;  %v852_v22 = vpop.permute.xlu1 %851 }
 0x333   : > { %1493 = vmatmul.mubr.msk.bf16.vlgmr.msra.gmra.mrb[24].mxu1 %vm1142_vm10, %v2183_v50 }
 0x33a   : > { %v847_v0 = vpop.permute.xlu0 %846 }
 0x33e   : > { %v857_v5 = vpop.permute.xlu0 %856 }
 0x3ca   : > { %v1236_v43 = vpop.f32.mrb[8].mxu1 }
 0x3cb   : > { %v1238_v15 = vpop.f32.mrb[9].mxu1 }
 0x3cc   : > { %v1240_v44 = vpop.f32.mrb[10].mxu1 }
 0x3cd   : > { %v1242_v45 = vpop.f32.mrb[11].mxu1 }
 0x3d2   : > { %v1246_v14 = vpop.f32.mrb[12].mxu1 }
 0x3d3   : > { %v1248_v25 = vpop.f32.mrb[13].mxu1 }
 0x3d4   : > { %v1250_v47 = vpop.f32.mrb[14].mxu1 }
 0x3d5   : > { %v1252_v40 = vpop.f32.mrb[15].mxu1 }
 0x3f6   : > { %v1472_v36 = vpop.f32.mrb[16].mxu1 }
 0x3f7   : > { %v1473_v39 = vpop.f32.mrb[17].mxu1 }
 0x3f8   : > { %v1474_v34 = vadd.f32 %v1473_v39, %v1472_v36  ;;  %v1475_v60 = vpop.f32.mrb[18].mxu1 }
 0x3f9   : > { %v1476_v46 = vpop.f32.mrb[19].mxu1 }
 0x3fa   : > { %v1477_v51 = vadd.f32 %v1476_v46, %v1475_v60  ;;  %v1290_v13 = vadd.f32 %v1474_v34, %v842_v42 }
 0x3fc   : > { %v1293_v23 = vadd.f32 %v1477_v51, %v847_v0 }
 0x3fd   : > { %v1183_v18 = vpop.f32.mrb[8].mxu0 }
 0x3fe   : > { %v1184_v28 = vadd.f32 %v1183_v18, %v842_v42  ;;  %v1185_v50 = vpop.f32.mrb[9].mxu0  ;;  %v1478_v53 = vpop.f32.mrb[20].mxu1 }
 0x3ff   : > { %v1186_v21 = vadd.f32 %v1185_v50, %v842_v42  ;;  %v1187_v20 = vpop.f32.mrb[10].mxu0  ;;  %v1479_v54 = vpop.f32.mrb[21].mxu1 }
 0x400   : > { %v1237_v6 = vadd.f32 %v1236_v43, %v1184_v28  ;;  %v1188_v57 = vadd.f32 %v1187_v20, %v847_v0  ;;  %v1480_v58 = vadd.f32 %v1479_v54, %v1478_v53  ;;  %v1189_v63 = vpop.f32.mrb[11].mxu0  ;;  %v1481_v17 = vpop.f32.mrb[22].mxu1 }
 0x401   : > { %v1239_v59 = vadd.f32 %v1238_v15, %v1186_v21  ;;  %v1190_v35 = vadd.f32 %v1189_v63, %v847_v0  ;;  %v1482_v61 = vpop.f32.mrb[23].mxu1 }
 0x402   : > { %1353 = vst [vmem:[%s2264_s28] sm:$0xff] %v1237_v6  ;;  %v1241_v52 = vadd.f32 %v1240_v44, %v1188_v57  ;;  %v1483_v62 = vadd.f32 %v1482_v61, %v1481_v17  ;;  %v1298_v4 = vadd.f32 %v1480_v58, %v852_v22 }
 0x403   : > { %1354 = vst [vmem:[%s2264_s28 + $0x8] sm:$0xff] %v1239_v59  ;;  %v1243_v3 = vadd.f32 %v1242_v45, %v1190_v35 }
 0x404   : > { %1356 = vst [vmem:[%s2264_s28 + $0x18] sm:$0xff] %v1241_v52  ;;  %v1301_v19 = vadd.f32 %v1483_v62, %v857_v5 }
 0x405   : > { %1357 = vst [vmem:[%s2264_s28 + $0x20] sm:$0xff] %v1243_v3  ;;  %v1193_v9 = vpop.f32.mrb[12].mxu0 }
 0x406   : > { %v1194_v7 = vadd.f32 %v1193_v9, %v852_v22  ;;  %v1195_v10 = vpop.f32.mrb[13].mxu0  ;;  %v1494_v49 = vpop.f32.mrb[24].mxu1 }
 0x407   : > { %v1196_v56 = vadd.f32 %v1195_v10, %v852_v22  ;;  %v1347_v24 = vadd.f32 %v1494_v49, %v1298_v4  ;;  %v1197_v8 = vpop.f32.mrb[14].mxu0  ;;  %v1338_v30 = vpop.f32.mrb[25].mxu1 }
 0x408   : > { %v1247_v32 = vadd.f32 %v1246_v14, %v1194_v7  ;;  %v1198_v48 = vadd.f32 %v1197_v8, %v857_v5  ;;  %v1339_v2 = vadd.f32 %v1338_v30, %v1290_v13  ;;  %v1199_v12 = vpop.f32.mrb[15].mxu0  ;;  %v1495_v31 = vpop.f32.mrb[26].mxu1 }
 0x409   : > { %v1249_v37 = vadd.f32 %v1248_v25, %v1196_v56  ;;  %1361 = vst [vmem:[%s2264_s28 + $0x40] sm:$0xff] %v1347_v24  ;;  %v1200_v1 = vadd.f32 %v1199_v12, %v857_v5  ;;  %v1350_v26 = vadd.f32 %v1495_v31, %v1301_v19  ;;  %v1341_v38 = vpop.f32.mrb[27].mxu1 }
 0x40a   : > { %1359 = vst [vmem:[%s2264_s28 + $0x30] sm:$0xff] %v1247_v32  ;;  %v1251_v11 = vadd.f32 %v1250_v47, %v1198_v48  ;;  %1355 = vst [vmem:[%s2264_s28 + $0x10] sm:$0xff] %v1339_v2  ;;  %v1342_v27 = vadd.f32 %v1341_v38, %v1293_v23 }
 0x40b   : > { %1360 = vst [vmem:[%s2264_s28 + $0x38] sm:$0xff] %v1249_v37  ;;  %v1253_v29 = vadd.f32 %v1252_v40, %v1200_v1  ;;  %1364 = vst [vmem:[%s2264_s28 + $0x58] sm:$0xff] %v1350_v26 }
 0x40c   : > { %1362 = vst [vmem:[%s2264_s28 + $0x48] sm:$0xff] %v1251_v11  ;;  %1358 = vst [vmem:[%s2264_s28 + $0x28] sm:$0xff] %v1342_v27 }
 0x40d   : > { %1363 = vst [vmem:[%s2264_s28 + $0x50] sm:$0xff] %v1253_v29 }
 0x40e PF: > { %s16_s21 = sadd.s32 1, %s1600_s21  }
 0x40f   : > { %p13_p4 = scmp.ge.s32.totalorder %s16_s21, 4  }
 0x411   :  { %15 = sbr.rel (!%p13_p4) target bundleno = 1 (0x1), region = 74 }

</bundles_post_ra>
